<compile_context>
chip_gen: v7x
topology: tpu7x:2x2x1
jax: 0.10.0
libtpu: 0.0.40
codegen_flags: <defaults>
</compile_context>

<pallas_src>
import functools
import math

import jax
import jax.numpy as jnp
from jax import lax
from jax.experimental import pallas as pl
from jax.experimental.pallas import tpu as pltpu

F32 = jnp.float32
BF16 = jnp.bfloat16
LN_EPS = 1e-5
GELU_C = 0.7978845608028654  # sqrt(2/pi)


# --------------------------- generation-aware plan ----------------------------

def _device_plan():
    """Tile sizes / scoped-VMEM budget from the local TPU generation.

    v5e/v6e: 128 MiB VMEM -> large row tiles so each streamed weight tile is
    amortized over more MXU work (v6e is weight-DMA bound at tm=256).
    v7x: 64 MiB VMEM -> tm~512, 48 MiB scoped budget.
    """
    vmem_cap = 64 * 1024 * 1024
    try:
        info = pltpu.get_tpu_info()
        vmem_cap = int(getattr(info, "vmem_capacity_bytes", vmem_cap))
    except Exception:
        pass
    if vmem_cap >= 100 * 1024 * 1024:          # v5e / v6e (128 MiB VMEM)
        return dict(vmem_limit=100 * 1024 * 1024,
                    tm_proj=1024, tm_mlp=512, tn=512, tch=1024, tq=512, tv=4096)
    # v7x (64 MiB VMEM) or unknown -> conservative plan
    return dict(vmem_limit=48 * 1024 * 1024,
                tm_proj=512, tm_mlp=256, tn=512, tch=512, tq=256, tv=2048)


PLAN = _device_plan()


def _cparams(dim_sem):
    return pltpu.CompilerParams(dimension_semantics=dim_sem,
                                vmem_limit_bytes=PLAN["vmem_limit"])


# ----------------------------- tiling helpers --------------------------------

def _row_tile(n, target):
    """Sublane (row) tile: full dim when small, else the plan target."""
    return n if n <= target else target


def _col_tile(n, target):
    """Lane (column) tile: full when small; else prefer a 256-multiple divisor
    (full MXU passes on v6e/v7x), then 128-multiple, else a padded 256-multiple
    (edge blocks are discarded by masked output writes)."""
    if n <= target:
        return n
    for step in (256, 128):
        t = (target // step) * step
        while t >= step:
            if n % t == 0:
                return t
            t -= step
    return max((target // 256) * 256, 128)


def _q_tile(T, target):
    """q-tile must divide T exactly (row blocks of the flat slab)."""
    if T <= target:
        return T
    t = (target // 8) * 8
    while t >= 8:
        if T % t == 0:
            return t
        t -= 8
    return T


# ----------------------------- Pallas kernels --------------------------------

def _ln_linear_kernel(x_ref, g_ref, b_ref, w_ref, wb_ref, o_ref, xn_ref):
    """Fused LayerNorm(x) @ W + b.

    LN stats / normalized xn are computed once per row tile (at column tile 0)
    and cached in bf16 VMEM scratch; column tiles j > 0 only do the MXU matmul.
    """
    @pl.when(pl.program_id(1) == 0)
    def _():
        x = x_ref[...].astype(F32)
        mean = jnp.mean(x, axis=-1, keepdims=True)
        var = jnp.mean(jnp.square(x - mean), axis=-1, keepdims=True)
        xn = (x - mean) * lax.rsqrt(var + LN_EPS) * g_ref[...] + b_ref[...]
        xn_ref[...] = xn.astype(BF16)

    y = jnp.dot(xn_ref[...], w_ref[...], preferred_element_type=F32)
    o_ref[...] = (y + wb_ref[...]).astype(o_ref.dtype)


def ln_linear(x, gamma, beta, w, wb, *, out_dtype=F32):
    N, C = x.shape
    Cout = w.shape[1]
    tm = _row_tile(N, PLAN["tm_proj"])
    tn = _col_tile(Cout, PLAN["tn"])
    grid = (pl.cdiv(N, tm), pl.cdiv(Cout, tn))
    return pl.pallas_call(
        _ln_linear_kernel,
        out_shape=jax.ShapeDtypeStruct((N, Cout), out_dtype),
        grid=grid,
        in_specs=[pl.BlockSpec((tm, C), lambda i, j: (i, 0)),
                  pl.BlockSpec((1, C), lambda i, j: (0, 0)),
                  pl.BlockSpec((1, C), lambda i, j: (0, 0)),
                  pl.BlockSpec((C, tn), lambda i, j: (0, j)),
                  pl.BlockSpec((1, tn), lambda i, j: (0, j))],
        out_specs=pl.BlockSpec((tm, tn), lambda i, j: (i, j)),
        scratch_shapes=[pltpu.VMEM((tm, C), BF16)],
        # column axis is sequential within a row tile (carries the LN cache)
        compiler_params=_cparams(("parallel", "arbitrary")),
    )(x, gamma.reshape(1, C), beta.reshape(1, C), w, wb.reshape(1, Cout))


def _attn_proj_kernel(qkv_ref, res_ref, pw_ref, pb_ref, o_ref, acc_ref, *, n_head, tq):
    """Causal MHA for one (batch, q-tile) step, fused with c_proj + residual add.

    qkv_ref : (T, 3C) bf16 qkv slab for this batch element (resident across q tiles)
    res_ref : (tq, C) f32 residual-stream tile
    o_ref   : (tq, C) f32 output tile = res + proj(attn)
    acc_ref : (tq, C) f32 scratch — per-head outputs streamed into lane slices
    """
    T = qkv_ref.shape[0]
    C = o_ref.shape[1]
    Dh = C // n_head
    scale = 1.0 / math.sqrt(Dh)

    q0 = pl.program_id(1) * tq
    if tq % 8 == 0:
        q0 = pl.multiple_of(q0, 8)

    row = lax.broadcasted_iota(jnp.int32, (tq, T), 0) + q0
    col = lax.broadcasted_iota(jnp.int32, (tq, T), 1)
    causal = col <= row                      # hoisted, shared across heads

    dn = (((1,), (1,)), ((), ()))            # contract last dims (no K relayout)
    for h in range(n_head):                  # statically unrolled; 2-D MXU matmuls
        # Fold 1/sqrt(Dh) into q (tq x Dh) rather than scaling the tq x T scores.
        qh = (qkv_ref[pl.ds(q0, tq), h * Dh:(h + 1) * Dh].astype(F32) * scale).astype(BF16)
        kh = qkv_ref[:, C + h * Dh:C + (h + 1) * Dh]
        vh = qkv_ref[:, 2 * C + h * Dh:2 * C + (h + 1) * Dh]
        s = lax.dot_general(qh, kh, dimension_numbers=dn, preferred_element_type=F32)
        s = jnp.where(causal, s, -1e30)
        m = jnp.max(s, axis=-1, keepdims=True)
        p = jnp.exp(s - m)
        denom = jnp.sum(p, axis=-1, keepdims=True)
        p = p * pl.reciprocal(denom, approx=True)     # EUP slot; ~1e-3 rel err vs exact
        acc_ref[:, h * Dh:(h + 1) * Dh] = jnp.dot(p.astype(BF16), vh,
                                                  preferred_element_type=F32)

    # c_proj + residual fused into the output store (saves a (B*T, C) slab round-trip).
    y = jnp.dot(acc_ref[...].astype(BF16), pw_ref[...], preferred_element_type=F32)
    o_ref[...] = (res_ref[...] + y + pb_ref[...]).astype(o_ref.dtype)
    # TODO(synk): for T >= ~1024 on v7x, switch to flash-style kv tiling with
    # online-softmax scratch and skip kv tiles fully above the causal diagonal.


def attention_block(qkv, x_res, proj_w, proj_b, *, batch, n_head):
    N, C3 = qkv.shape
    C = C3 // 3
    T = N // batch
    tq = _q_tile(T, PLAN["tq"])
    n_qt = T // tq
    kern = functools.partial(_attn_proj_kernel, n_head=n_head, tq=tq)
    return pl.pallas_call(
        kern,
        out_shape=jax.ShapeDtypeStruct((N, C), F32),
        grid=(batch, n_qt),
        in_specs=[pl.BlockSpec((T, C3), lambda b, q: (b, 0)),
                  pl.BlockSpec((tq, C), lambda b, q, n_qt=n_qt: (b * n_qt + q, 0)),
                  pl.BlockSpec((C, C), lambda b, q: (0, 0)),
                  pl.BlockSpec((1, C), lambda b, q: (0, 0))],
        out_specs=pl.BlockSpec((tq, C), lambda b, q, n_qt=n_qt: (b * n_qt + q, 0)),
        scratch_shapes=[pltpu.VMEM((tq, C), F32)],
        compiler_params=_cparams(("parallel", "parallel")),
    )(qkv, x_res, proj_w, proj_b.reshape(1, C))


def _ln_mlp_residual_kernel(x_ref, g_ref, b_ref, w1_ref, b1_ref, w2_ref, b2_ref,
                            o_ref, xn_ref, acc_ref):
    """x + MLP(LayerNorm(x)), with the hidden dim Ch tiled as a reduction axis.

    k == 0           : compute LN once (cached bf16) and zero the accumulator.
    every k          : h_k = GELU(xn @ w1[:, k]) ; acc += h_k @ w2[k, :]
    k == last        : store x + acc + b2.
    Weights stream per Ch tile, so the full (C,4C)+(4C,C) pair never has to be
    double-buffered in VMEM (v7x 64 MiB constraint).
    """
    k = pl.program_id(1)

    @pl.when(k == 0)
    def _():
        x = x_ref[...].astype(F32)
        mean = jnp.mean(x, axis=-1, keepdims=True)
        var = jnp.mean(jnp.square(x - mean), axis=-1, keepdims=True)
        xn = (x - mean) * lax.rsqrt(var + LN_EPS) * g_ref[...] + b_ref[...]
        xn_ref[...] = xn.astype(BF16)
        acc_ref[...] = jnp.zeros_like(acc_ref)

    h = jnp.dot(xn_ref[...], w1_ref[...], preferred_element_type=F32) + b1_ref[...]
    # GPT-2 tanh-approximate GELU (f32 on VPU/EUP)
    h = 0.5 * h * (1.0 + jnp.tanh(GELU_C * (h + 0.044715 * h * h * h)))
    acc_ref[...] += jnp.dot(h.astype(BF16), w2_ref[...], preferred_element_type=F32)

    @pl.when(k == pl.num_programs(1) - 1)
    def _():
        o_ref[...] = (x_ref[...].astype(F32) + acc_ref[...] + b2_ref[...]).astype(o_ref.dtype)


def ln_mlp_residual(x, gamma, beta, w1, b1, w2, b2):
    N, C = x.shape
    Ch = w1.shape[1]
    tm = _row_tile(N, PLAN["tm_mlp"])
    tch = _col_tile(Ch, PLAN["tch"])
    if Ch % tch != 0:
        tch = Ch  # a padded reduction tile would corrupt the accumulator
    grid = (pl.cdiv(N, tm), Ch // tch)
    return pl.pallas_call(
        _ln_mlp_residual_kernel,
        out_shape=jax.ShapeDtypeStruct((N, C), F32),
        grid=grid,
        in_specs=[pl.BlockSpec((tm, C), lambda i, k: (i, 0)),
                  pl.BlockSpec((1, C), lambda i, k: (0, 0)),
                  pl.BlockSpec((1, C), lambda i, k: (0, 0)),
                  pl.BlockSpec((C, tch), lambda i, k: (0, k)),
                  pl.BlockSpec((1, tch), lambda i, k: (0, k)),
                  pl.BlockSpec((tch, C), lambda i, k: (k, 0)),
                  pl.BlockSpec((1, C), lambda i, k: (0, 0))],
        out_specs=pl.BlockSpec((tm, C), lambda i, k: (i, 0)),
        scratch_shapes=[pltpu.VMEM((tm, C), BF16), pltpu.VMEM((tm, C), F32)],
        compiler_params=_cparams(("parallel", "arbitrary")),
    )(x, gamma.reshape(1, C), beta.reshape(1, C),
      w1, b1.reshape(1, Ch), w2, b2.reshape(1, C))


def _ln_lmhead_kernel(x_ref, g_ref, b_ref, wte_ref, o_ref, xn_ref):
    """Final LayerNorm fused with the (tied, bias-free) lm_head.

    LN is computed once (vocab tile 0) and cached; wte is used AS STORED
    (vocab, C) — dot_general contracts on C, so no runtime transpose — and the
    vocab axis is tiled by the grid.
    """
    @pl.when(pl.program_id(0) == 0)
    def _():
        x = x_ref[...].astype(F32)
        mean = jnp.mean(x, axis=-1, keepdims=True)
        var = jnp.mean(jnp.square(x - mean), axis=-1, keepdims=True)
        xn = (x - mean) * lax.rsqrt(var + LN_EPS) * g_ref[...] + b_ref[...]
        xn_ref[...] = xn.astype(BF16)

    logits = lax.dot_general(xn_ref[...], wte_ref[...],
                             dimension_numbers=(((1,), (1,)), ((), ())),
                             preferred_element_type=F32)
    o_ref[...] = logits.astype(o_ref.dtype)


def ln_lm_head(x_last, gamma, beta, wte):
    B, C = x_last.shape
    V = wte.shape[0]
    # NOTE: padding V to a 128-multiple (e.g. 50304) avoids masked edge tiles.
    tv = _col_tile(V, PLAN["tv"])
    grid = (pl.cdiv(V, tv),)
    return pl.pallas_call(
        _ln_lmhead_kernel,
        out_shape=jax.ShapeDtypeStruct((B, V), F32),
        grid=grid,
        in_specs=[pl.BlockSpec((B, C), lambda j: (0, 0)),
                  pl.BlockSpec((1, C), lambda j: (0, 0)),
                  pl.BlockSpec((1, C), lambda j: (0, 0)),
                  pl.BlockSpec((tv, C), lambda j: (j, 0))],
        out_specs=pl.BlockSpec((B, tv), lambda j: (0, j)),
        scratch_shapes=[pltpu.VMEM((B, C), BF16)],
        compiler_params=_cparams(("arbitrary",)),   # carries the LN cache
    )(x_last, gamma.reshape(1, C), beta.reshape(1, C), wte)


# ----------------------------- parameter setup -------------------------------

def init_params(key, *, vocab_size, block_size, n_embed, n_head, n_layer):
    ks = iter(jax.random.split(key, 4 + 8 * n_layer))

    def normal(k, shape, std=0.02, dtype=BF16):
        # bf16 weights: MXU operands / halved HBM traffic; f32 elsewhere.
        return (jax.random.normal(k, shape, F32) * std).astype(dtype)

    params = {
        "wte": normal(next(ks), (vocab_size, n_embed)),     # tied with lm_head
        "wpe": normal(next(ks), (block_size, n_embed)),
        "norm_g": jnp.ones((n_embed,), F32),
        "norm_b": jnp.zeros((n_embed,), F32),
        "blocks": [],
    }
    proj_std = 0.02 / math.sqrt(2 * n_layer)
    for _ in range(n_layer):
        blk = {
            "ln1_g": jnp.ones((n_embed,), F32),
            "ln1_b": jnp.zeros((n_embed,), F32),
            "attn_w": normal(next(ks), (n_embed, 3 * n_embed)),          # (Cin, Cout)
            "attn_b": jnp.zeros((3 * n_embed,), F32),
            "proj_w": normal(next(ks), (n_embed, n_embed), proj_std),    # c_proj
            "proj_b": jnp.zeros((n_embed,), F32),
            "ln2_g": jnp.ones((n_embed,), F32),
            "ln2_b": jnp.zeros((n_embed,), F32),
            "fc_w": normal(next(ks), (n_embed, 4 * n_embed)),
            "fc_b": jnp.zeros((4 * n_embed,), F32),
            "fc2_w": normal(next(ks), (4 * n_embed, n_embed), proj_std),  # mlp c_proj
            "fc2_b": jnp.zeros((n_embed,), F32),
        }
        params["blocks"].append(blk)
    return params


# ----------------------------- forward pass -----------------------------------

def gpt_forward(params, inputs, *, n_head):
    """Matches GPT.forward(inputs, targets=None): logits for last position, (B, 1, vocab)."""
    B, T = inputs.shape
    C = params["wte"].shape[1]

    # token + positional embeddings (gather is glue; dropout is identity at eval)
    tok = jnp.take(params["wte"], inputs, axis=0)            # (B, T, C) bf16
    pos = params["wpe"][:T]                                   # (T, C)    bf16
    x = (tok + pos[None, :, :]).astype(F32).reshape(B * T, C)

    for blk in params["blocks"]:
        # --- attention sub-block: LN1+QKV fused (bf16 handoff), MHA+proj+residual fused ---
        qkv = ln_linear(x, blk["ln1_g"], blk["ln1_b"], blk["attn_w"], blk["attn_b"],
                        out_dtype=BF16)                        # (B*T, 3C) bf16
        x = attention_block(qkv, x, blk["proj_w"], blk["proj_b"],
                            batch=B, n_head=n_head)            # (B*T, C) f32

        # --- MLP sub-block: LN2 + fc + GELU + proj + residual, Ch-tiled reduction ---
        x = ln_mlp_residual(x, blk["ln2_g"], blk["ln2_b"],
                            blk["fc_w"], blk["fc_b"], blk["fc2_w"], blk["fc2_b"])

    # final LN fused with the tied, bias-free lm_head on the last token only
    x_last = x.reshape(B, T, C)[:, -1, :]                      # (B, C)
    logits = ln_lm_head(x_last, params["norm_g"], params["norm_b"], params["wte"])
    return logits.reshape(B, 1, -1)


# ----------------------------------- main --------------------------------------

if __name__ == "__main__":
    config = dict(
        n_embedding=32,
        n_head=4,
        n_layer=2,
        block_size=16,
        vocab_size=64,
        bias=True,
        dropout=0.0,
    )
    B, T = 2, 8

    key = jax.random.PRNGKey(0)
    pkey, ikey = jax.random.split(key)
    params = init_params(
        pkey,
        vocab_size=config["vocab_size"],
        block_size=config["block_size"],
        n_embed=config["n_embedding"],
        n_head=config["n_head"],
        n_layer=config["n_layer"],
    )
    inputs = jax.random.randint(ikey, (B, T), 0, config["vocab_size"], dtype=jnp.int32)

    fwd = jax.jit(functools.partial(gpt_forward, n_head=config["n_head"]))
    logits = jax.block_until_ready(fwd(params, inputs))
    assert logits.shape == (B, 1, config["vocab_size"])
    assert jnp.all(jnp.isfinite(logits))
    # TODO(synk): generate() sampling (torch.multinomial / top-k) is host-side control
    # flow and not part of the kernelized forward pass.
    print("KERNEL_OK")
</pallas_src>

<mosaic_0001>
module attributes {stable_mosaic.version = 11 : i64} {
  func.func @_ln_linear_kernel(%arg0: i32, %arg1: i32, %arg2: memref<16x32xf32, #tpu.memory_space<vmem>>, %arg3: memref<1x32xf32, #tpu.memory_space<vmem>>, %arg4: memref<1x32xf32, #tpu.memory_space<vmem>>, %arg5: memref<32x96xbf16, #tpu.memory_space<vmem>>, %arg6: memref<1x96xf32, #tpu.memory_space<vmem>>, %arg7: memref<16x96xbf16, #tpu.memory_space<vmem>>, %arg8: memref<16x32xbf16, #tpu.memory_space<vmem>>) attributes {dimension_semantics = [#tpu.dimension_semantics<parallel>, #tpu.dimension_semantics<arbitrary>], iteration_bounds = array<i64: 1, 1>, scalar_prefetch = 0 : i64, scratch_operands = 1 : i64, tpu.core_type = #tpu.core_type<tc>, window_params = [{transform_indices = @transform_0, window_bounds = array<i64: 16, 32>}, {pipeline_mode = #tpu.pipeline_mode<synchronous>, transform_indices = @transform_1, window_bounds = array<i64: 1, 32>}, {pipeline_mode = #tpu.pipeline_mode<synchronous>, transform_indices = @transform_2, window_bounds = array<i64: 1, 32>}, {transform_indices = @transform_3, window_bounds = array<i64: 32, 96>}, {transform_indices = @transform_4, window_bounds = array<i64: 1, 96>}, {transform_indices = @transform_5, window_bounds = array<i64: 16, 96>}]} {
    %c0_i32 = arith.constant 0 : i32
    %0 = arith.cmpi eq, %arg1, %c0_i32 : i32
    %1 = arith.extui %0 : i1 to i32
    %c0_i32_0 = arith.constant 0 : i32
    %2 = arith.cmpi ne, %1, %c0_i32_0 : i32
    scf.if %2 {
      %c0_8 = arith.constant 0 : index
      %c0_9 = arith.constant 0 : index
      %11 = vector.load %arg2[%c0_8, %c0_9] : memref<16x32xf32, #tpu.memory_space<vmem>>, vector<16x32xf32>
      %cst_10 = arith.constant dense<0.000000e+00> : vector<16xf32>
      %12 = vector.multi_reduction <add>, %11, %cst_10 [1] : vector<16x32xf32> to vector<16xf32>
      %13 = vector.shape_cast %12 : vector<16xf32> to vector<16x1xf32>
      %cst_11 = arith.constant 3.200000e+01 : f32
      %14 = vector.broadcast %cst_11 : f32 to vector<16x1xf32>
      %15 = arith.divf %13, %14 : vector<16x1xf32>
      %16 = vector.broadcast %15 : vector<16x1xf32> to vector<16x32xf32>
      %17 = arith.subf %11, %16 : vector<16x32xf32>
      %18 = arith.mulf %17, %17 : vector<16x32xf32>
      %cst_12 = arith.constant dense<0.000000e+00> : vector<16xf32>
      %19 = vector.multi_reduction <add>, %18, %cst_12 [1] : vector<16x32xf32> to vector<16xf32>
      %20 = vector.shape_cast %19 : vector<16xf32> to vector<16x1xf32>
      %cst_13 = arith.constant 3.200000e+01 : f32
      %21 = vector.broadcast %cst_13 : f32 to vector<16x1xf32>
      %22 = arith.divf %20, %21 : vector<16x1xf32>
      %23 = vector.broadcast %15 : vector<16x1xf32> to vector<16x32xf32>
      %24 = arith.subf %11, %23 : vector<16x32xf32>
      %cst_14 = arith.constant 9.99999974E-6 : f32
      %25 = vector.broadcast %cst_14 : f32 to vector<16x1xf32>
      %26 = arith.addf %22, %25 : vector<16x1xf32>
      %27 = math.rsqrt %26 : vector<16x1xf32>
      %28 = vector.broadcast %27 : vector<16x1xf32> to vector<16x32xf32>
      %29 = arith.mulf %24, %28 : vector<16x32xf32>
      %c0_15 = arith.constant 0 : index
      %c0_16 = arith.constant 0 : index
      %30 = vector.load %arg3[%c0_15, %c0_16] : memref<1x32xf32, #tpu.memory_space<vmem>>, vector<1x32xf32>
      %31 = vector.broadcast %30 : vector<1x32xf32> to vector<16x32xf32>
      %32 = arith.mulf %29, %31 : vector<16x32xf32>
      %c0_17 = arith.constant 0 : index
      %c0_18 = arith.constant 0 : index
      %33 = vector.load %arg4[%c0_17, %c0_18] : memref<1x32xf32, #tpu.memory_space<vmem>>, vector<1x32xf32>
      %34 = vector.broadcast %33 : vector<1x32xf32> to vector<16x32xf32>
      %35 = arith.addf %32, %34 : vector<16x32xf32>
      %36 = arith.truncf %35 : vector<16x32xf32> to vector<16x32xbf16>
      %c0_19 = arith.constant 0 : index
      %c0_20 = arith.constant 0 : index
      %37 = vector.load %arg8[%c0_19, %c0_20] : memref<16x32xbf16, #tpu.memory_space<vmem>>, vector<16x32xbf16>
      tpu.vector_store %arg8[%c0_19, %c0_20], %36 {strides = array<i32>} : memref<16x32xbf16, #tpu.memory_space<vmem>>, vector<16x32xbf16>,
    } else {
    }
    %c0 = arith.constant 0 : index
    %c0_1 = arith.constant 0 : index
    %3 = vector.load %arg8[%c0, %c0_1] : memref<16x32xbf16, #tpu.memory_space<vmem>>, vector<16x32xbf16>
    %c0_2 = arith.constant 0 : index
    %c0_3 = arith.constant 0 : index
    %4 = vector.load %arg5[%c0_2, %c0_3] : memref<32x96xbf16, #tpu.memory_space<vmem>>, vector<32x96xbf16>
    %cst = arith.constant dense<0.000000e+00> : vector<16x96xf32>
    %5 = tpu.matmul %3, %4, %cst {dimension_numbers = #tpu.dot_dimension_numbers<[1], [0], [0], [1], [0, 0, 1, 1], [], []>} : vector<16x32xbf16>, vector<32x96xbf16>, vector<16x96xf32> -> vector<16x96xf32>
    %c0_4 = arith.constant 0 : index
    %c0_5 = arith.constant 0 : index
    %6 = vector.load %arg6[%c0_4, %c0_5] : memref<1x96xf32, #tpu.memory_space<vmem>>, vector<1x96xf32>
    %7 = vector.broadcast %6 : vector<1x96xf32> to vector<16x96xf32>
    %8 = arith.addf %5, %7 : vector<16x96xf32>
    %9 = arith.truncf %8 : vector<16x96xf32> to vector<16x96xbf16>
    %c0_6 = arith.constant 0 : index
    %c0_7 = arith.constant 0 : index
    %10 = vector.load %arg7[%c0_6, %c0_7] : memref<16x96xbf16, #tpu.memory_space<vmem>>, vector<16x96xbf16>
    tpu.vector_store %arg7[%c0_6, %c0_7], %9 {strides = array<i32>} : memref<16x96xbf16, #tpu.memory_space<vmem>>, vector<16x96xbf16>,
    return
  }
  func.func @transform_0(%arg0: i32, %arg1: i32) -> (i32, i32) {
    %c0_i32 = arith.constant 0 : i32
    %c0_i32_0 = arith.constant 0 : i32
    return %arg0, %c0_i32 : i32, i32
  }
  func.func @transform_1(%arg0: i32, %arg1: i32) -> (i32, i32) {
    %c0_i32 = arith.constant 0 : i32
    %c0_i32_0 = arith.constant 0 : i32
    %c0_i32_1 = arith.constant 0 : i32
    return %c0_i32, %c0_i32_0 : i32, i32
  }
  func.func @transform_2(%arg0: i32, %arg1: i32) -> (i32, i32) {
    %c0_i32 = arith.constant 0 : i32
    %c0_i32_0 = arith.constant 0 : i32
    %c0_i32_1 = arith.constant 0 : i32
    return %c0_i32, %c0_i32_0 : i32, i32
  }
  func.func @transform_3(%arg0: i32, %arg1: i32) -> (i32, i32) {
    %c0_i32 = arith.constant 0 : i32
    %c0_i32_0 = arith.constant 0 : i32
    return %c0_i32, %arg1 : i32, i32
  }
  func.func @transform_4(%arg0: i32, %arg1: i32) -> (i32, i32) {
    %c0_i32 = arith.constant 0 : i32
    %c0_i32_0 = arith.constant 0 : i32
    return %c0_i32, %arg1 : i32, i32
  }
  func.func @transform_5(%arg0: i32, %arg1: i32) -> (i32, i32) {
    %c0_i32 = arith.constant 0 : i32
    return %arg0, %arg1 : i32, i32
  }
}

module attributes {stable_mosaic.version = 11 : i64} {
  func.func @_attn_proj_kernel(%arg0: i32, %arg1: i32, %arg2: memref<8x96xbf16, #tpu.memory_space<vmem>>, %arg3: memref<8x32xf32, #tpu.memory_space<vmem>>, %arg4: memref<32x32xbf16, #tpu.memory_space<vmem>>, %arg5: memref<1x32xf32, #tpu.memory_space<vmem>>, %arg6: memref<8x32xf32, #tpu.memory_space<vmem>>, %arg7: memref<8x32xf32, #tpu.memory_space<vmem>>) attributes {dimension_semantics = [#tpu.dimension_semantics<parallel>, #tpu.dimension_semantics<parallel>], iteration_bounds = array<i64: 2, 1>, scalar_prefetch = 0 : i64, scratch_operands = 1 : i64, tpu.core_type = #tpu.core_type<tc>, window_params = [{transform_indices = @transform_0, window_bounds = array<i64: 8, 96>}, {transform_indices = @transform_1, window_bounds = array<i64: 8, 32>}, {pipeline_mode = #tpu.pipeline_mode<synchronous>, transform_indices = @transform_2, window_bounds = array<i64: 32, 32>}, {pipeline_mode = #tpu.pipeline_mode<synchronous>, transform_indices = @transform_3, window_bounds = array<i64: 1, 32>}, {transform_indices = @transform_4, window_bounds = array<i64: 8, 32>}]} {
    %c8_i32 = arith.constant 8 : i32
    %0 = arith.muli %arg1, %c8_i32 : i32
    %1 = tpu.assume_multiple %0, 8 : i32
    %2 = tpu.iota {dimensions = array<i32: 0>} : vector<8x8xi32>
    %3 = vector.broadcast %1 : i32 to vector<8x8xi32>
    %4 = arith.addi %2, %3 : vector<8x8xi32>
    %5 = tpu.iota {dimensions = array<i32: 1>} : vector<8x8xi32>
    %6 = arith.cmpi sle, %5, %4 : vector<8x8xi32>
    %7 = arith.index_cast %1 : i32 to index
    %c0 = arith.constant 0 : index
    %8 = vector.load %arg2[%7, %c0] : memref<8x96xbf16, #tpu.memory_space<vmem>>, vector<8x8xbf16>
    %9 = arith.extf %8 : vector<8x8xbf16> to vector<8x8xf32>
    %cst = arith.constant 0.353553385 : f32
    %10 = vector.broadcast %cst : f32 to vector<8x8xf32>
    %11 = arith.mulf %9, %10 : vector<8x8xf32>
    %12 = arith.truncf %11 : vector<8x8xf32> to vector<8x8xbf16>
    %c0_0 = arith.constant 0 : index
    %c32 = arith.constant 32 : index
    %13 = vector.load %arg2[%c0_0, %c32] : memref<8x96xbf16, #tpu.memory_space<vmem>>, vector<8x8xbf16>
    %c0_1 = arith.constant 0 : index
    %c64 = arith.constant 64 : index
    %14 = vector.load %arg2[%c0_1, %c64] : memref<8x96xbf16, #tpu.memory_space<vmem>>, vector<8x8xbf16>
    %cst_2 = arith.constant dense<0.000000e+00> : vector<8x8xf32>
    %15 = tpu.matmul %12, %13, %cst_2 {dimension_numbers = #tpu.dot_dimension_numbers<[1], [1], [0], [0], [0, 0, 1, 0], [], []>} : vector<8x8xbf16>, vector<8x8xbf16>, vector<8x8xf32> -> vector<8x8xf32>
    %cst_3 = arith.constant -1.000000e+30 : f32
    %16 = vector.broadcast %cst_3 : f32 to vector<8x8xf32>
    %17 = arith.select %6, %15, %16 : vector<8x8xi1>, vector<8x8xf32>
    %cst_4 = arith.constant dense<0xFF800000> : vector<8xf32>
    %18 = vector.multi_reduction <maximumf>, %17, %cst_4 [1] : vector<8x8xf32> to vector<8xf32>
    %19 = vector.shape_cast %18 : vector<8xf32> to vector<8x1xf32>
    %20 = vector.broadcast %19 : vector<8x1xf32> to vector<8x8xf32>
    %21 = arith.subf %17, %20 : vector<8x8xf32>
    %22 = math.exp %21 : vector<8x8xf32>
    %cst_5 = arith.constant dense<0.000000e+00> : vector<8xf32>
    %23 = vector.multi_reduction <add>, %22, %cst_5 [1] : vector<8x8xf32> to vector<8xf32>
    %24 = vector.shape_cast %23 : vector<8xf32> to vector<8x1xf32>
    %25 = tpu.reciprocal %24 {approx = true} : vector<8x1xf32> -> vector<8x1xf32>
    %26 = vector.broadcast %25 : vector<8x1xf32> to vector<8x8xf32>
    %27 = arith.mulf %22, %26 : vector<8x8xf32>
    %28 = arith.truncf %27 : vector<8x8xf32> to vector<8x8xbf16>
    %cst_6 = arith.constant dense<0.000000e+00> : vector<8x8xf32>
    %29 = tpu.matmul %28, %14, %cst_6 {dimension_numbers = #tpu.dot_dimension_numbers<[1], [0], [0], [1], [0, 0, 1, 1], [], []>} : vector<8x8xbf16>, vector<8x8xbf16>, vector<8x8xf32> -> vector<8x8xf32>
    %c0_7 = arith.constant 0 : index
    %c0_8 = arith.constant 0 : index
    %30 = vector.load %arg7[%c0_7, %c0_8] : memref<8x32xf32, #tpu.memory_space<vmem>>, vector<8x8xf32>
    tpu.vector_store %arg7[%c0_7, %c0_8], %29 {strides = array<i32>} : memref<8x32xf32, #tpu.memory_space<vmem>>, vector<8x8xf32>,
    %31 = arith.index_cast %1 : i32 to index
    %c8 = arith.constant 8 : index
    %32 = vector.load %arg2[%31, %c8] : memref<8x96xbf16, #tpu.memory_space<vmem>>, vector<8x8xbf16>
    %33 = arith.extf %32 : vector<8x8xbf16> to vector<8x8xf32>
    %cst_9 = arith.constant 0.353553385 : f32
    %34 = vector.broadcast %cst_9 : f32 to vector<8x8xf32>
    %35 = arith.mulf %33, %34 : vector<8x8xf32>
    %36 = arith.truncf %35 : vector<8x8xf32> to vector<8x8xbf16>
    %c0_10 = arith.constant 0 : index
    %c40 = arith.constant 40 : index
    %37 = vector.load %arg2[%c0_10, %c40] : memref<8x96xbf16, #tpu.memory_space<vmem>>, vector<8x8xbf16>
    %c0_11 = arith.constant 0 : index
    %c72 = arith.constant 72 : index
    %38 = vector.load %arg2[%c0_11, %c72] : memref<8x96xbf16, #tpu.memory_space<vmem>>, vector<8x8xbf16>
    %cst_12 = arith.constant dense<0.000000e+00> : vector<8x8xf32>
    %39 = tpu.matmul %36, %37, %cst_12 {dimension_numbers = #tpu.dot_dimension_numbers<[1], [1], [0], [0], [0, 0, 1, 0], [], []>} : vector<8x8xbf16>, vector<8x8xbf16>, vector<8x8xf32> -> vector<8x8xf32>
    %cst_13 = arith.constant -1.000000e+30 : f32
    %40 = vector.broadcast %cst_13 : f32 to vector<8x8xf32>
    %41 = arith.select %6, %39, %40 : vector<8x8xi1>, vector<8x8xf32>
    %cst_14 = arith.constant dense<0xFF800000> : vector<8xf32>
    %42 = vector.multi_reduction <maximumf>, %41, %cst_14 [1] : vector<8x8xf32> to vector<8xf32>
    %43 = vector.shape_cast %42 : vector<8xf32> to vector<8x1xf32>
    %44 = vector.broadcast %43 : vector<8x1xf32> to vector<8x8xf32>
    %45 = arith.subf %41, %44 : vector<8x8xf32>
    %46 = math.exp %45 : vector<8x8xf32>
    %cst_15 = arith.constant dense<0.000000e+00> : vector<8xf32>
    %47 = vector.multi_reduction <add>, %46, %cst_15 [1] : vector<8x8xf32> to vector<8xf32>
    %48 = vector.shape_cast %47 : vector<8xf32> to vector<8x1xf32>
    %49 = tpu.reciprocal %48 {approx = true} : vector<8x1xf32> -> vector<8x1xf32>
    %50 = vector.broadcast %49 : vector<8x1xf32> to vector<8x8xf32>
    %51 = arith.mulf %46, %50 : vector<8x8xf32>
    %52 = arith.truncf %51 : vector<8x8xf32> to vector<8x8xbf16>
    %cst_16 = arith.constant dense<0.000000e+00> : vector<8x8xf32>
    %53 = tpu.matmul %52, %38, %cst_16 {dimension_numbers = #tpu.dot_dimension_numbers<[1], [0], [0], [1], [0, 0, 1, 1], [], []>} : vector<8x8xbf16>, vector<8x8xbf16>, vector<8x8xf32> -> vector<8x8xf32>
    %c0_17 = arith.constant 0 : index
    %c8_18 = arith.constant 8 : index
    %54 = vector.load %arg7[%c0_17, %c8_18] : memref<8x32xf32, #tpu.memory_space<vmem>>, vector<8x8xf32>
    tpu.vector_store %arg7[%c0_17, %c8_18], %53 {strides = array<i32>} : memref<8x32xf32, #tpu.memory_space<vmem>>, vector<8x8xf32>,
    %55 = arith.index_cast %1 : i32 to index
    %c16 = arith.constant 16 : index
    %56 = vector.load %arg2[%55, %c16] : memref<8x96xbf16, #tpu.memory_space<vmem>>, vector<8x8xbf16>
    %57 = arith.extf %56 : vector<8x8xbf16> to vector<8x8xf32>
    %cst_19 = arith.constant 0.353553385 : f32
    %58 = vector.broadcast %cst_19 : f32 to vector<8x8xf32>
    %59 = arith.mulf %57, %58 : vector<8x8xf32>
    %60 = arith.truncf %59 : vector<8x8xf32> to vector<8x8xbf16>
    %c0_20 = arith.constant 0 : index
    %c48 = arith.constant 48 : index
    %61 = vector.load %arg2[%c0_20, %c48] : memref<8x96xbf16, #tpu.memory_space<vmem>>, vector<8x8xbf16>
    %c0_21 = arith.constant 0 : index
    %c80 = arith.constant 80 : index
    %62 = vector.load %arg2[%c0_21, %c80] : memref<8x96xbf16, #tpu.memory_space<vmem>>, vector<8x8xbf16>
    %cst_22 = arith.constant dense<0.000000e+00> : vector<8x8xf32>
    %63 = tpu.matmul %60, %61, %cst_22 {dimension_numbers = #tpu.dot_dimension_numbers<[1], [1], [0], [0], [0, 0, 1, 0], [], []>} : vector<8x8xbf16>, vector<8x8xbf16>, vector<8x8xf32> -> vector<8x8xf32>
    %cst_23 = arith.constant -1.000000e+30 : f32
    %64 = vector.broadcast %cst_23 : f32 to vector<8x8xf32>
    %65 = arith.select %6, %63, %64 : vector<8x8xi1>, vector<8x8xf32>
    %cst_24 = arith.constant dense<0xFF800000> : vector<8xf32>
    %66 = vector.multi_reduction <maximumf>, %65, %cst_24 [1] : vector<8x8xf32> to vector<8xf32>
    %67 = vector.shape_cast %66 : vector<8xf32> to vector<8x1xf32>
    %68 = vector.broadcast %67 : vector<8x1xf32> to vector<8x8xf32>
    %69 = arith.subf %65, %68 : vector<8x8xf32>
    %70 = math.exp %69 : vector<8x8xf32>
    %cst_25 = arith.constant dense<0.000000e+00> : vector<8xf32>
    %71 = vector.multi_reduction <add>, %70, %cst_25 [1] : vector<8x8xf32> to vector<8xf32>
    %72 = vector.shape_cast %71 : vector<8xf32> to vector<8x1xf32>
    %73 = tpu.reciprocal %72 {approx = true} : vector<8x1xf32> -> vector<8x1xf32>
    %74 = vector.broadcast %73 : vector<8x1xf32> to vector<8x8xf32>
    %75 = arith.mulf %70, %74 : vector<8x8xf32>
    %76 = arith.truncf %75 : vector<8x8xf32> to vector<8x8xbf16>
    %cst_26 = arith.constant dense<0.000000e+00> : vector<8x8xf32>
    %77 = tpu.matmul %76, %62, %cst_26 {dimension_numbers = #tpu.dot_dimension_numbers<[1], [0], [0], [1], [0, 0, 1, 1], [], []>} : vector<8x8xbf16>, vector<8x8xbf16>, vector<8x8xf32> -> vector<8x8xf32>
    %c0_27 = arith.constant 0 : index
    %c16_28 = arith.constant 16 : index
    %78 = vector.load %arg7[%c0_27, %c16_28] : memref<8x32xf32, #tpu.memory_space<vmem>>, vector<8x8xf32>
    tpu.vector_store %arg7[%c0_27, %c16_28], %77 {strides = array<i32>} : memref<8x32xf32, #tpu.memory_space<vmem>>, vector<8x8xf32>,
    %79 = arith.index_cast %1 : i32 to index
    %c24 = arith.constant 24 : index
    %80 = vector.load %arg2[%79, %c24] : memref<8x96xbf16, #tpu.memory_space<vmem>>, vector<8x8xbf16>
    %81 = arith.extf %80 : vector<8x8xbf16> to vector<8x8xf32>
    %cst_29 = arith.constant 0.353553385 : f32
    %82 = vector.broadcast %cst_29 : f32 to vector<8x8xf32>
    %83 = arith.mulf %81, %82 : vector<8x8xf32>
    %84 = arith.truncf %83 : vector<8x8xf32> to vector<8x8xbf16>
    %c0_30 = arith.constant 0 : index
    %c56 = arith.constant 56 : index
    %85 = vector.load %arg2[%c0_30, %c56] : memref<8x96xbf16, #tpu.memory_space<vmem>>, vector<8x8xbf16>
    %c0_31 = arith.constant 0 : index
    %c88 = arith.constant 88 : index
    %86 = vector.load %arg2[%c0_31, %c88] : memref<8x96xbf16, #tpu.memory_space<vmem>>, vector<8x8xbf16>
    %cst_32 = arith.constant dense<0.000000e+00> : vector<8x8xf32>
    %87 = tpu.matmul %84, %85, %cst_32 {dimension_numbers = #tpu.dot_dimension_numbers<[1], [1], [0], [0], [0, 0, 1, 0], [], []>} : vector<8x8xbf16>, vector<8x8xbf16>, vector<8x8xf32> -> vector<8x8xf32>
    %cst_33 = arith.constant -1.000000e+30 : f32
    %88 = vector.broadcast %cst_33 : f32 to vector<8x8xf32>
    %89 = arith.select %6, %87, %88 : vector<8x8xi1>, vector<8x8xf32>
    %cst_34 = arith.constant dense<0xFF800000> : vector<8xf32>
    %90 = vector.multi_reduction <maximumf>, %89, %cst_34 [1] : vector<8x8xf32> to vector<8xf32>
    %91 = vector.shape_cast %90 : vector<8xf32> to vector<8x1xf32>
    %92 = vector.broadcast %91 : vector<8x1xf32> to vector<8x8xf32>
    %93 = arith.subf %89, %92 : vector<8x8xf32>
    %94 = math.exp %93 : vector<8x8xf32>
    %cst_35 = arith.constant dense<0.000000e+00> : vector<8xf32>
    %95 = vector.multi_reduction <add>, %94, %cst_35 [1] : vector<8x8xf32> to vector<8xf32>
    %96 = vector.shape_cast %95 : vector<8xf32> to vector<8x1xf32>
    %97 = tpu.reciprocal %96 {approx = true} : vector<8x1xf32> -> vector<8x1xf32>
    %98 = vector.broadcast %97 : vector<8x1xf32> to vector<8x8xf32>
    %99 = arith.mulf %94, %98 : vector<8x8xf32>
    %100 = arith.truncf %99 : vector<8x8xf32> to vector<8x8xbf16>
    %cst_36 = arith.constant dense<0.000000e+00> : vector<8x8xf32>
    %101 = tpu.matmul %100, %86, %cst_36 {dimension_numbers = #tpu.dot_dimension_numbers<[1], [0], [0], [1], [0, 0, 1, 1], [], []>} : vector<8x8xbf16>, vector<8x8xbf16>, vector<8x8xf32> -> vector<8x8xf32>
    %c0_37 = arith.constant 0 : index
    %c24_38 = arith.constant 24 : index
    %102 = vector.load %arg7[%c0_37, %c24_38] : memref<8x32xf32, #tpu.memory_space<vmem>>, vector<8x8xf32>
    tpu.vector_store %arg7[%c0_37, %c24_38], %101 {strides = array<i32>} : memref<8x32xf32, #tpu.memory_space<vmem>>, vector<8x8xf32>,
    %c0_39 = arith.constant 0 : index
    %c0_40 = arith.constant 0 : index
    %103 = vector.load %arg7[%c0_39, %c0_40] : memref<8x32xf32, #tpu.memory_space<vmem>>, vector<8x32xf32>
    %104 = arith.truncf %103 : vector<8x32xf32> to vector<8x32xbf16>
    %c0_41 = arith.constant 0 : index
    %c0_42 = arith.constant 0 : index
    %105 = vector.load %arg4[%c0_41, %c0_42] : memref<32x32xbf16, #tpu.memory_space<vmem>>, vector<32x32xbf16>
    %cst_43 = arith.constant dense<0.000000e+00> : vector<8x32xf32>
    %106 = tpu.matmul %104, %105, %cst_43 {dimension_numbers = #tpu.dot_dimension_numbers<[1], [0], [0], [1], [0, 0, 1, 1], [], []>} : vector<8x32xbf16>, vector<32x32xbf16>, vector<8x32xf32> -> vector<8x32xf32>
    %c0_44 = arith.constant 0 : index
    %c0_45 = arith.constant 0 : index
    %107 = vector.load %arg3[%c0_44, %c0_45] : memref<8x32xf32, #tpu.memory_space<vmem>>, vector<8x32xf32>
    %108 = arith.addf %107, %106 : vector<8x32xf32>
    %c0_46 = arith.constant 0 : index
    %c0_47 = arith.constant 0 : index
    %109 = vector.load %arg5[%c0_46, %c0_47] : memref<1x32xf32, #tpu.memory_space<vmem>>, vector<1x32xf32>
    %110 = vector.broadcast %109 : vector<1x32xf32> to vector<8x32xf32>
    %111 = arith.addf %108, %110 : vector<8x32xf32>
    %c0_48 = arith.constant 0 : index
    %c0_49 = arith.constant 0 : index
    %112 = vector.load %arg6[%c0_48, %c0_49] : memref<8x32xf32, #tpu.memory_space<vmem>>, vector<8x32xf32>
    tpu.vector_store %arg6[%c0_48, %c0_49], %111 {strides = array<i32>} : memref<8x32xf32, #tpu.memory_space<vmem>>, vector<8x32xf32>,
    return
  }
  func.func @transform_0(%arg0: i32, %arg1: i32) -> (i32, i32) {
    %c0_i32 = arith.constant 0 : i32
    %c0_i32_0 = arith.constant 0 : i32
    return %arg0, %c0_i32 : i32, i32
  }
  func.func @transform_1(%arg0: i32, %arg1: i32) -> (i32, i32) {
    %c1_i32 = arith.constant 1 : i32
    %0 = arith.muli %arg0, %c1_i32 : i32
    %1 = arith.addi %0, %arg1 : i32
    %c0_i32 = arith.constant 0 : i32
    %c0_i32_0 = arith.constant 0 : i32
    return %1, %c0_i32 : i32, i32
  }
  func.func @transform_2(%arg0: i32, %arg1: i32) -> (i32, i32) {
    %c0_i32 = arith.constant 0 : i32
    %c0_i32_0 = arith.constant 0 : i32
    %c0_i32_1 = arith.constant 0 : i32
    return %c0_i32, %c0_i32_0 : i32, i32
  }
  func.func @transform_3(%arg0: i32, %arg1: i32) -> (i32, i32) {
    %c0_i32 = arith.constant 0 : i32
    %c0_i32_0 = arith.constant 0 : i32
    %c0_i32_1 = arith.constant 0 : i32
    return %c0_i32, %c0_i32_0 : i32, i32
  }
  func.func @transform_4(%arg0: i32, %arg1: i32) -> (i32, i32) {
    %c1_i32 = arith.constant 1 : i32
    %0 = arith.muli %arg0, %c1_i32 : i32
    %1 = arith.addi %0, %arg1 : i32
    %c0_i32 = arith.constant 0 : i32
    %c0_i32_0 = arith.constant 0 : i32
    return %1, %c0_i32 : i32, i32
  }
}

module attributes {stable_mosaic.version = 11 : i64} {
  func.func @_ln_mlp_residual_kernel(%arg0: i32, %arg1: i32, %arg2: memref<16x32xf32, #tpu.memory_space<vmem>>, %arg3: memref<1x32xf32, #tpu.memory_space<vmem>>, %arg4: memref<1x32xf32, #tpu.memory_space<vmem>>, %arg5: memref<32x128xbf16, #tpu.memory_space<vmem>>, %arg6: memref<1x128xf32, #tpu.memory_space<vmem>>, %arg7: memref<128x32xbf16, #tpu.memory_space<vmem>>, %arg8: memref<1x32xf32, #tpu.memory_space<vmem>>, %arg9: memref<16x32xf32, #tpu.memory_space<vmem>>, %arg10: memref<16x32xbf16, #tpu.memory_space<vmem>>, %arg11: memref<16x32xf32, #tpu.memory_space<vmem>>) attributes {dimension_semantics = [#tpu.dimension_semantics<parallel>, #tpu.dimension_semantics<arbitrary>], iteration_bounds = array<i64: 1, 1>, scalar_prefetch = 0 : i64, scratch_operands = 2 : i64, tpu.core_type = #tpu.core_type<tc>, window_params = [{transform_indices = @transform_0, window_bounds = array<i64: 16, 32>}, {pipeline_mode = #tpu.pipeline_mode<synchronous>, transform_indices = @transform_1, window_bounds = array<i64: 1, 32>}, {pipeline_mode = #tpu.pipeline_mode<synchronous>, transform_indices = @transform_2, window_bounds = array<i64: 1, 32>}, {transform_indices = @transform_3, window_bounds = array<i64: 32, 128>}, {transform_indices = @transform_4, window_bounds = array<i64: 1, 128>}, {transform_indices = @transform_5, window_bounds = array<i64: 128, 32>}, {pipeline_mode = #tpu.pipeline_mode<synchronous>, transform_indices = @transform_6, window_bounds = array<i64: 1, 32>}, {transform_indices = @transform_7, window_bounds = array<i64: 16, 32>}]} {
    %c0_i32 = arith.constant 0 : i32
    %0 = arith.cmpi eq, %arg1, %c0_i32 : i32
    %1 = arith.extui %0 : i1 to i32
    %c0_i32_0 = arith.constant 0 : i32
    %2 = arith.cmpi ne, %1, %c0_i32_0 : i32
    scf.if %2 {
      %c0_19 = arith.constant 0 : index
      %c0_20 = arith.constant 0 : index
      %31 = vector.load %arg2[%c0_19, %c0_20] : memref<16x32xf32, #tpu.memory_space<vmem>>, vector<16x32xf32>
      %cst_21 = arith.constant dense<0.000000e+00> : vector<16xf32>
      %32 = vector.multi_reduction <add>, %31, %cst_21 [1] : vector<16x32xf32> to vector<16xf32>
      %33 = vector.shape_cast %32 : vector<16xf32> to vector<16x1xf32>
      %cst_22 = arith.constant 3.200000e+01 : f32
      %34 = vector.broadcast %cst_22 : f32 to vector<16x1xf32>
      %35 = arith.divf %33, %34 : vector<16x1xf32>
      %36 = vector.broadcast %35 : vector<16x1xf32> to vector<16x32xf32>
      %37 = arith.subf %31, %36 : vector<16x32xf32>
      %38 = arith.mulf %37, %37 : vector<16x32xf32>
      %cst_23 = arith.constant dense<0.000000e+00> : vector<16xf32>
      %39 = vector.multi_reduction <add>, %38, %cst_23 [1] : vector<16x32xf32> to vector<16xf32>
      %40 = vector.shape_cast %39 : vector<16xf32> to vector<16x1xf32>
      %cst_24 = arith.constant 3.200000e+01 : f32
      %41 = vector.broadcast %cst_24 : f32 to vector<16x1xf32>
      %42 = arith.divf %40, %41 : vector<16x1xf32>
      %43 = vector.broadcast %35 : vector<16x1xf32> to vector<16x32xf32>
      %44 = arith.subf %31, %43 : vector<16x32xf32>
      %cst_25 = arith.constant 9.99999974E-6 : f32
      %45 = vector.broadcast %cst_25 : f32 to vector<16x1xf32>
      %46 = arith.addf %42, %45 : vector<16x1xf32>
      %47 = math.rsqrt %46 : vector<16x1xf32>
      %48 = vector.broadcast %47 : vector<16x1xf32> to vector<16x32xf32>
      %49 = arith.mulf %44, %48 : vector<16x32xf32>
      %c0_26 = arith.constant 0 : index
      %c0_27 = arith.constant 0 : index
      %50 = vector.load %arg3[%c0_26, %c0_27] : memref<1x32xf32, #tpu.memory_space<vmem>>, vector<1x32xf32>
      %51 = vector.broadcast %50 : vector<1x32xf32> to vector<16x32xf32>
      %52 = arith.mulf %49, %51 : vector<16x32xf32>
      %c0_28 = arith.constant 0 : index
      %c0_29 = arith.constant 0 : index
      %53 = vector.load %arg4[%c0_28, %c0_29] : memref<1x32xf32, #tpu.memory_space<vmem>>, vector<1x32xf32>
      %54 = vector.broadcast %53 : vector<1x32xf32> to vector<16x32xf32>
      %55 = arith.addf %52, %54 : vector<16x32xf32>
      %56 = arith.truncf %55 : vector<16x32xf32> to vector<16x32xbf16>
      %c0_30 = arith.constant 0 : index
      %c0_31 = arith.constant 0 : index
      %57 = vector.load %arg10[%c0_30, %c0_31] : memref<16x32xbf16, #tpu.memory_space<vmem>>, vector<16x32xbf16>
      tpu.vector_store %arg10[%c0_30, %c0_31], %56 {strides = array<i32>} : memref<16x32xbf16, #tpu.memory_space<vmem>>, vector<16x32xbf16>,
      %cst_32 = arith.constant 0.000000e+00 : f32
      %58 = vector.broadcast %cst_32 : f32 to vector<16x32xf32>
      %c0_33 = arith.constant 0 : index
      %c0_34 = arith.constant 0 : index
      %59 = vector.load %arg11[%c0_33, %c0_34] : memref<16x32xf32, #tpu.memory_space<vmem>>, vector<16x32xf32>
      tpu.vector_store %arg11[%c0_33, %c0_34], %58 {strides = array<i32>} : memref<16x32xf32, #tpu.memory_space<vmem>>, vector<16x32xf32>,
    } else {
    }
    %c0 = arith.constant 0 : index
    %c0_1 = arith.constant 0 : index
    %3 = vector.load %arg10[%c0, %c0_1] : memref<16x32xbf16, #tpu.memory_space<vmem>>, vector<16x32xbf16>
    %c0_2 = arith.constant 0 : index
    %c0_3 = arith.constant 0 : index
    %4 = vector.load %arg5[%c0_2, %c0_3] : memref<32x128xbf16, #tpu.memory_space<vmem>>, vector<32x128xbf16>
    %cst = arith.constant dense<0.000000e+00> : vector<16x128xf32>
    %5 = tpu.matmul %3, %4, %cst {dimension_numbers = #tpu.dot_dimension_numbers<[1], [0], [0], [1], [0, 0, 1, 1], [], []>} : vector<16x32xbf16>, vector<32x128xbf16>, vector<16x128xf32> -> vector<16x128xf32>
    %c0_4 = arith.constant 0 : index
    %c0_5 = arith.constant 0 : index
    %6 = vector.load %arg6[%c0_4, %c0_5] : memref<1x128xf32, #tpu.memory_space<vmem>>, vector<1x128xf32>
    %7 = vector.broadcast %6 : vector<1x128xf32> to vector<16x128xf32>
    %8 = arith.addf %5, %7 : vector<16x128xf32>
    %cst_6 = arith.constant 5.000000e-01 : f32
    %9 = vector.broadcast %cst_6 : f32 to vector<16x128xf32>
    %10 = arith.mulf %9, %8 : vector<16x128xf32>
    %cst_7 = arith.constant 4.471500e-02 : f32
    %11 = vector.broadcast %cst_7 : f32 to vector<16x128xf32>
    %12 = arith.mulf %11, %8 : vector<16x128xf32>
    %13 = arith.mulf %12, %8 : vector<16x128xf32>
    %14 = arith.mulf %13, %8 : vector<16x128xf32>
    %15 = arith.addf %8, %14 : vector<16x128xf32>
    %cst_8 = arith.constant 0.797884583 : f32
    %16 = vector.broadcast %cst_8 : f32 to vector<16x128xf32>
    %17 = arith.mulf %16, %15 : vector<16x128xf32>
    %18 = math.tanh %17 : vector<16x128xf32>
    %cst_9 = arith.constant 1.000000e+00 : f32
    %19 = vector.broadcast %cst_9 : f32 to vector<16x128xf32>
    %20 = arith.addf %19, %18 : vector<16x128xf32>
    %21 = arith.mulf %10, %20 : vector<16x128xf32>
    %c0_10 = arith.constant 0 : index
    %c0_11 = arith.constant 0 : index
    %22 = vector.load %arg11[%c0_10, %c0_11] : memref<16x32xf32, #tpu.memory_space<vmem>>, vector<16x32xf32>
    %23 = arith.truncf %21 : vector<16x128xf32> to vector<16x128xbf16>
    %c0_12 = arith.constant 0 : index
    %c0_13 = arith.constant 0 : index
    %24 = vector.load %arg7[%c0_12, %c0_13] : memref<128x32xbf16, #tpu.memory_space<vmem>>, vector<128x32xbf16>
    %cst_14 = arith.constant dense<0.000000e+00> : vector<16x32xf32>
    %25 = tpu.matmul %23, %24, %cst_14 {dimension_numbers = #tpu.dot_dimension_numbers<[1], [0], [0], [1], [0, 0, 1, 1], [], []>} : vector<16x128xbf16>, vector<128x32xbf16>, vector<16x32xf32> -> vector<16x32xf32>
    %26 = arith.addf %22, %25 : vector<16x32xf32>
    %c0_15 = arith.constant 0 : index
    %c0_16 = arith.constant 0 : index
    %27 = vector.load %arg11[%c0_15, %c0_16] : memref<16x32xf32, #tpu.memory_space<vmem>>, vector<16x32xf32>
    tpu.vector_store %arg11[%c0_15, %c0_16], %26 {strides = array<i32>} : memref<16x32xf32, #tpu.memory_space<vmem>>, vector<16x32xf32>,
    %c0_i32_17 = arith.constant 0 : i32
    %28 = arith.cmpi eq, %arg1, %c0_i32_17 : i32
    %29 = arith.extui %28 : i1 to i32
    %c0_i32_18 = arith.constant 0 : i32
    %30 = arith.cmpi ne, %29, %c0_i32_18 : i32
    scf.if %30 {
      %c0_19 = arith.constant 0 : index
      %c0_20 = arith.constant 0 : index
      %31 = vector.load %arg2[%c0_19, %c0_20] : memref<16x32xf32, #tpu.memory_space<vmem>>, vector<16x32xf32>
      %c0_21 = arith.constant 0 : index
      %c0_22 = arith.constant 0 : index
      %32 = vector.load %arg11[%c0_21, %c0_22] : memref<16x32xf32, #tpu.memory_space<vmem>>, vector<16x32xf32>
      %33 = arith.addf %31, %32 : vector<16x32xf32>
      %c0_23 = arith.constant 0 : index
      %c0_24 = arith.constant 0 : index
      %34 = vector.load %arg8[%c0_23, %c0_24] : memref<1x32xf32, #tpu.memory_space<vmem>>, vector<1x32xf32>
      %35 = vector.broadcast %34 : vector<1x32xf32> to vector<16x32xf32>
      %36 = arith.addf %33, %35 : vector<16x32xf32>
      %c0_25 = arith.constant 0 : index
      %c0_26 = arith.constant 0 : index
      %37 = vector.load %arg9[%c0_25, %c0_26] : memref<16x32xf32, #tpu.memory_space<vmem>>, vector<16x32xf32>
      tpu.vector_store %arg9[%c0_25, %c0_26], %36 {strides = array<i32>} : memref<16x32xf32, #tpu.memory_space<vmem>>, vector<16x32xf32>,
    } else {
    }
    return
  }
  func.func @transform_0(%arg0: i32, %arg1: i32) -> (i32, i32) {
    %c0_i32 = arith.constant 0 : i32
    %c0_i32_0 = arith.constant 0 : i32
    return %arg0, %c0_i32 : i32, i32
  }
  func.func @transform_1(%arg0: i32, %arg1: i32) -> (i32, i32) {
    %c0_i32 = arith.constant 0 : i32
    %c0_i32_0 = arith.constant 0 : i32
    %c0_i32_1 = arith.constant 0 : i32
    return %c0_i32, %c0_i32_0 : i32, i32
  }
  func.func @transform_2(%arg0: i32, %arg1: i32) -> (i32, i32) {
    %c0_i32 = arith.constant 0 : i32
    %c0_i32_0 = arith.constant 0 : i32
    %c0_i32_1 = arith.constant 0 : i32
    return %c0_i32, %c0_i32_0 : i32, i32
  }
  func.func @transform_3(%arg0: i32, %arg1: i32) -> (i32, i32) {
    %c0_i32 = arith.constant 0 : i32
    %c0_i32_0 = arith.constant 0 : i32
    return %c0_i32, %arg1 : i32, i32
  }
  func.func @transform_4(%arg0: i32, %arg1: i32) -> (i32, i32) {
    %c0_i32 = arith.constant 0 : i32
    %c0_i32_0 = arith.constant 0 : i32
    return %c0_i32, %arg1 : i32, i32
  }
  func.func @transform_5(%arg0: i32, %arg1: i32) -> (i32, i32) {
    %c0_i32 = arith.constant 0 : i32
    %c0_i32_0 = arith.constant 0 : i32
    return %arg1, %c0_i32 : i32, i32
  }
  func.func @transform_6(%arg0: i32, %arg1: i32) -> (i32, i32) {
    %c0_i32 = arith.constant 0 : i32
    %c0_i32_0 = arith.constant 0 : i32
    %c0_i32_1 = arith.constant 0 : i32
    return %c0_i32, %c0_i32_0 : i32, i32
  }
  func.func @transform_7(%arg0: i32, %arg1: i32) -> (i32, i32) {
    %c0_i32 = arith.constant 0 : i32
    %c0_i32_0 = arith.constant 0 : i32
    return %arg0, %c0_i32 : i32, i32
  }
}

module attributes {stable_mosaic.version = 11 : i64} {
  func.func @_ln_lmhead_kernel(%arg0: i32, %arg1: memref<2x32xf32, #tpu.memory_space<vmem>>, %arg2: memref<1x32xf32, #tpu.memory_space<vmem>>, %arg3: memref<1x32xf32, #tpu.memory_space<vmem>>, %arg4: memref<64x32xbf16, #tpu.memory_space<vmem>>, %arg5: memref<2x64xf32, #tpu.memory_space<vmem>>, %arg6: memref<2x32xbf16, #tpu.memory_space<vmem>>) attributes {dimension_semantics = [#tpu.dimension_semantics<arbitrary>], iteration_bounds = array<i64: 1>, scalar_prefetch = 0 : i64, scratch_operands = 1 : i64, tpu.core_type = #tpu.core_type<tc>, window_params = [{pipeline_mode = #tpu.pipeline_mode<synchronous>, transform_indices = @transform_0, window_bounds = array<i64: 2, 32>}, {pipeline_mode = #tpu.pipeline_mode<synchronous>, transform_indices = @transform_1, window_bounds = array<i64: 1, 32>}, {pipeline_mode = #tpu.pipeline_mode<synchronous>, transform_indices = @transform_2, window_bounds = array<i64: 1, 32>}, {transform_indices = @transform_3, window_bounds = array<i64: 64, 32>}, {transform_indices = @transform_4, window_bounds = array<i64: 2, 64>}]} {
    %c0_i32 = arith.constant 0 : i32
    %0 = arith.cmpi eq, %arg0, %c0_i32 : i32
    %1 = arith.extui %0 : i1 to i32
    %c0_i32_0 = arith.constant 0 : i32
    %2 = arith.cmpi ne, %1, %c0_i32_0 : i32
    scf.if %2 {
      %c0_6 = arith.constant 0 : index
      %c0_7 = arith.constant 0 : index
      %7 = vector.load %arg1[%c0_6, %c0_7] : memref<2x32xf32, #tpu.memory_space<vmem>>, vector<2x32xf32>
      %cst_8 = arith.constant dense<0.000000e+00> : vector<2xf32>
      %8 = vector.multi_reduction <add>, %7, %cst_8 [1] : vector<2x32xf32> to vector<2xf32>
      %9 = vector.shape_cast %8 : vector<2xf32> to vector<2x1xf32>
      %cst_9 = arith.constant 3.200000e+01 : f32
      %10 = vector.broadcast %cst_9 : f32 to vector<2x1xf32>
      %11 = arith.divf %9, %10 : vector<2x1xf32>
      %12 = vector.broadcast %11 : vector<2x1xf32> to vector<2x32xf32>
      %13 = arith.subf %7, %12 : vector<2x32xf32>
      %14 = arith.mulf %13, %13 : vector<2x32xf32>
      %cst_10 = arith.constant dense<0.000000e+00> : vector<2xf32>
      %15 = vector.multi_reduction <add>, %14, %cst_10 [1] : vector<2x32xf32> to vector<2xf32>
      %16 = vector.shape_cast %15 : vector<2xf32> to vector<2x1xf32>
      %cst_11 = arith.constant 3.200000e+01 : f32
      %17 = vector.broadcast %cst_11 : f32 to vector<2x1xf32>
      %18 = arith.divf %16, %17 : vector<2x1xf32>
      %19 = vector.broadcast %11 : vector<2x1xf32> to vector<2x32xf32>
      %20 = arith.subf %7, %19 : vector<2x32xf32>
      %cst_12 = arith.constant 9.99999974E-6 : f32
      %21 = vector.broadcast %cst_12 : f32 to vector<2x1xf32>
      %22 = arith.addf %18, %21 : vector<2x1xf32>
      %23 = math.rsqrt %22 : vector<2x1xf32>
      %24 = vector.broadcast %23 : vector<2x1xf32> to vector<2x32xf32>
      %25 = arith.mulf %20, %24 : vector<2x32xf32>
      %c0_13 = arith.constant 0 : index
      %c0_14 = arith.constant 0 : index
      %26 = vector.load %arg2[%c0_13, %c0_14] : memref<1x32xf32, #tpu.memory_space<vmem>>, vector<1x32xf32>
      %27 = vector.broadcast %26 : vector<1x32xf32> to vector<2x32xf32>
      %28 = arith.mulf %25, %27 : vector<2x32xf32>
      %c0_15 = arith.constant 0 : index
      %c0_16 = arith.constant 0 : index
      %29 = vector.load %arg3[%c0_15, %c0_16] : memref<1x32xf32, #tpu.memory_space<vmem>>, vector<1x32xf32>
      %30 = vector.broadcast %29 : vector<1x32xf32> to vector<2x32xf32>
      %31 = arith.addf %28, %30 : vector<2x32xf32>
      %32 = arith.truncf %31 : vector<2x32xf32> to vector<2x32xbf16>
      %c0_17 = arith.constant 0 : index
      %c0_18 = arith.constant 0 : index
      %33 = vector.load %arg6[%c0_17, %c0_18] : memref<2x32xbf16, #tpu.memory_space<vmem>>, vector<2x32xbf16>
      tpu.vector_store %arg6[%c0_17, %c0_18], %32 {strides = array<i32>} : memref<2x32xbf16, #tpu.memory_space<vmem>>, vector<2x32xbf16>,
    } else {
    }
    %c0 = arith.constant 0 : index
    %c0_1 = arith.constant 0 : index
    %3 = vector.load %arg6[%c0, %c0_1] : memref<2x32xbf16, #tpu.memory_space<vmem>>, vector<2x32xbf16>
    %c0_2 = arith.constant 0 : index
    %c0_3 = arith.constant 0 : index
    %4 = vector.load %arg4[%c0_2, %c0_3] : memref<64x32xbf16, #tpu.memory_space<vmem>>, vector<64x32xbf16>
    %cst = arith.constant dense<0.000000e+00> : vector<2x64xf32>
    %5 = tpu.matmul %3, %4, %cst {dimension_numbers = #tpu.dot_dimension_numbers<[1], [1], [0], [0], [0, 0, 1, 0], [], []>} : vector<2x32xbf16>, vector<64x32xbf16>, vector<2x64xf32> -> vector<2x64xf32>
    %c0_4 = arith.constant 0 : index
    %c0_5 = arith.constant 0 : index
    %6 = vector.load %arg5[%c0_4, %c0_5] : memref<2x64xf32, #tpu.memory_space<vmem>>, vector<2x64xf32>
    tpu.vector_store %arg5[%c0_4, %c0_5], %5 {strides = array<i32>} : memref<2x64xf32, #tpu.memory_space<vmem>>, vector<2x64xf32>,
    return
  }
  func.func @transform_0(%arg0: i32) -> (i32, i32) {
    %c0_i32 = arith.constant 0 : i32
    %c0_i32_0 = arith.constant 0 : i32
    %c0_i32_1 = arith.constant 0 : i32
    return %c0_i32, %c0_i32_0 : i32, i32
  }
  func.func @transform_1(%arg0: i32) -> (i32, i32) {
    %c0_i32 = arith.constant 0 : i32
    %c0_i32_0 = arith.constant 0 : i32
    %c0_i32_1 = arith.constant 0 : i32
    return %c0_i32, %c0_i32_0 : i32, i32
  }
  func.func @transform_2(%arg0: i32) -> (i32, i32) {
    %c0_i32 = arith.constant 0 : i32
    %c0_i32_0 = arith.constant 0 : i32
    %c0_i32_1 = arith.constant 0 : i32
    return %c0_i32, %c0_i32_0 : i32, i32
  }
  func.func @transform_3(%arg0: i32) -> (i32, i32) {
    %c0_i32 = arith.constant 0 : i32
    %c0_i32_0 = arith.constant 0 : i32
    return %arg0, %c0_i32 : i32, i32
  }
  func.func @transform_4(%arg0: i32) -> (i32, i32) {
    %c0_i32 = arith.constant 0 : i32
    %c0_i32_0 = arith.constant 0 : i32
    return %c0_i32, %arg0 : i32, i32
  }
}

</mosaic_0001>

<bundles_post_ra>
// kernel: gpt_forward.13
= control target key start
LH: loop header
LB: loop body
LE: loop exit
PB: predicated region body
PF: predicated region fallthrough
CT: control target
= control target key end

     0   :  { %vm24_vm0 = vcmask 254976   ;;  %s282_s0 = inlined_call_operand.vmem [shape: f32[2,32], index: 0, kind: input, shape index: {}]   ;;  %s283_s1 = inlined_call_operand.vmem [shape: f32[1,32], index: 1, kind: input, shape index: {}]   ;;  %s284_s2 = inlined_call_operand.vmem [shape: f32[1,32], index: 2, kind: input, shape index: {}]   ;;  %s285_s3 = inlined_call_operand.vmem [shape: bf16[64,32], index: 3, kind: input, shape index: {}]   ;;  %s286_s4 = inlined_call_operand.hbm [shape: f32[2,64], index: 4, kind: output, shape index: {}]  }
   0x1   :  { %v23_v0 = vld [vmem:[%s282_s0] sm:$0x3] }
   0x2   :  { %v25_v1 = vsel %vm24_vm0, %v23_v0, 0.0 }
   0x3   :  { %26 = vadd.xlane.f32.xlu0 %v25_v1 }
   0x4   :  { %9 = vsyncpa [#allocation4], 0  ;;  %v216_v2 = vmov 0.0   ;;  %v186_v8 = vld [vmem:[%s285_s3] sm:$0xff]   ;;  %vm87_vm1 = vcmask 261120   ;;  %v187_v10 = vld [vmem:[%s285_s3 + $0x8] sm:$0xff]  }
   0x5   :  { %171 = vmatprep.subr.bf16.mxu0 %v216_v2  ;;  %v92_v9 = vsel %vm87_vm1, %v186_v8, 0  ;;  %v95_v11 = vsel %vm87_vm1, %v187_v10, 0  ;;  %v188_v12 = vld [vmem:[%s285_s3 + $0x10] sm:$0xff]   ;;  %v189_v14 = vld [vmem:[%s285_s3 + $0x18] sm:$0xff]   ;;  %vm217_vm2 = vmmov 0   ;;  %vm56_vm3 = vcmask 253952  }
   0x6   :  { %172 = vmatpush3.bf16.xpose.msra.mxu0 %v92_v9  ;;  %v98_v13 = vsel %vm87_vm1, %v188_v12, 0  ;;  %v101_v15 = vsel %vm87_vm1, %v189_v14, 0  ;;  %179 = vmatprep.mubr.msk.bf16.mxu0 %vm217_vm2, %v216_v2  ;;  %v159_v20 = vld [vmem:[%s283_s1] ss:$0 sm:$0xff]  ;;  %s218_s3 = smov [#allocation3]   ;;  %vm143_vm4 = vcmask 517120  }
   0x7   :  { %173 = vmatprep.subr.bf16.mxu0 %v216_v2  ;;  %v160_v22 = vld [vmem:[%s284_s2] ss:$0 sm:$0xff]  ;;  %s151_s28 = sshll.u32 %s218_s3, 4  ;;  %s152_s28 = int_to_ptr.vmem [resolvable:$true] %s151_s28 }
   0x8   :  { %s192_s1 = scalar_lea.vmem %s152_s28, 32  ;;  %p197_p1 = scmp.lt.s32.totalorder %s152_s28, %s152_s28 }
   0x9   :  { %p193_p0 = scmp.ne.s32.totalorder %s152_s28, %s192_s1  ;;  %p198_p2 = scmp.lt.s32.totalorder %s192_s1, %s192_s1 }
   0xb   :  { %p199_p3 = por %p198_p2, %p197_p1 }
   0xd   :  { %p200_p4 = pnand %p199_p3, %p193_p0 }
   0xe   :  { %174 = vmatpush3.bf16.xpose.msra.mxu0 %v95_v11 }
   0xf   :  { %175 = vmatprep.subr.bf16.mxu0 %v216_v2 }
  0x16   :  { %176 = vmatpush3.bf16.xpose.msra.mxu0 %v98_v13 }
  0x17   :  { %177 = vmatprep.subr.bf16.mxu0 %v216_v2 }
  0x1e   :  { %178 = vmatpush3.bf16.xpose.msra.mxu0 %v101_v15 }
  0x90   :  { %v27_v3 = vpop.xlane.xlu0 %26 }
  0x91   :  { %v29_v4 = vmul.f32 0.03125, %v27_v3 }
  0x93   :  { %v30_v5 = vsub.f32 %v23_v0, %v29_v4 }
  0x95   :  { %v31_v6 = vmul.f32 %v30_v5, %v30_v5 }
  0x97   :  { %v32_v7 = vsel %vm24_vm0, %v31_v6, 0.0 }
  0x98   :  { %33 = vadd.xlane.f32.xlu0 %v32_v7 }
 0x125   :  { %v34_v16 = vpop.xlane.xlu0 %33 }
 0x126   :  { %v35_v17 = vmul.f32 0.03125, %v34_v16 }
 0x128   :  { %v36_v18 = vadd.f32 1e-05, %v35_v17 }
 0x12a   :  { %190 = vrsqrt.f32 %v36_v18 }
 0x134   :  { %v191_v19 = vpop.eup %190 }
 0x135   :  { %v38_v21 = vmul.f32 %v191_v19, %v30_v5 }
 0x137   :  { %v46_v23 = vmul.f32 %v159_v20, %v38_v21 }
 0x139   :  { %v54_v24 = vadd.f32 %v160_v22, %v46_v23 }
 0x13b   :  { %v55_v25 = vpack.c.bf16 %v54_v24, %v54_v24 }
 0x13d   :  { %57 = vst.msk [vmem:[#allocation2] sm:$0x1] %vm56_vm3, %v55_v25 }
 0x144   :  { %v58_v26 = vld [vmem:[#allocation2] sm:$0x1] }
 0x145   :  { %180 = vmatmul.mubr.msk.bf16.vlgmr.msra.gmra.mrb[0].mxu0 %vm87_vm1, %v58_v26 }
 0x218   :  { %v137_v27 = vpop.f32.mrb[0].mxu0 }
 0x219   :  { %144 = vst.msk [vmem:[#allocation3] sm:$0x3] %vm143_vm4, %v137_v27  ;;  %v181_v28 = vpop.f32.mrb[1].mxu0 }
 0x21a   :  { %v140_v29 = vpop.f32.mrb[2].mxu0 }
 0x21b   :  { %203 = shalt.err (!%p200_p4)
}
 0x21c   :  { %s204_s30 = scalar_lea.hbm %s286_s4, 32 }
 0x21d   :  { %p205_p5 = scmp.ne.s32.totalorder %s286_s4, %s204_s30  ;;  %p208_p6 = scmp.lt.u32.totalorder %s204_s30, %s286_s4 }
 0x21f   :  { %p210_p7 = pnand %p208_p6, %p205_p5 }
 0x221   :  { %213 = shalt.err (!%p210_p7)
}
 0x222   :  { %154 = dma.vmem_to_hbm [thread:$0]  %s152_s28, 32, %s286_s4, [#allocation4]   ;;  %v182_v30 = vpop.f32.mrb[3].mxu0 }
 0x223   :  { %214 = dma.done.wait [#allocation4], 32  }
 0x224   :  { %215 = vsyncadd [#allocation4], 4294967264 }
 0x225   :  { %158 = vsyncpa [#allocation4], 1 }

// kernel: gpt_forward.7
= control target key start
LH: loop header
LB: loop body
LE: loop exit
PB: predicated region body
PF: predicated region fallthrough
CT: control target
= control target key end

     0   :  { %vm27_vm0 = vcmask 261120   ;;  %v188_v15 = vmov 0.0   ;;  %vm189_vm1 = vmmov 0   ;;  %vm152_vm2 = vcmask 781312   ;;  %s253_s0 = inlined_call_operand.vmem [shape: f32[16,32], index: 0, kind: input, shape index: {}]   ;;  %s254_s3 = inlined_call_operand.vmem [shape: bf16[32,96], index: 3, kind: input, shape index: {}]   ;;  %s255_s1 = inlined_call_operand.vmem [shape: f32[1,32], index: 1, kind: input, shape index: {}]   ;;  %s256_s2 = inlined_call_operand.vmem [shape: f32[1,32], index: 2, kind: input, shape index: {}]   ;;  %s257_s4 = inlined_call_operand.vmem [shape: f32[1,96], index: 4, kind: input, shape index: {}]   ;;  %s258_s5 = inlined_call_operand.vmem [shape: bf16[16,96], index: 5, kind: output, shape index: {}]  }
   0x1   :  { %v25_v0 = vld [vmem:[%s253_s0] sm:$0xff]  ;;  %v26_v1 = vld [vmem:[%s253_s0 + $0x8] sm:$0xff]  ;;  %172 = vmatprep.subr.bf16.mxu0 %v188_v15  ;;  %176 = vmatprep.mubr.msk.bf16.mxu0 %vm189_vm1, %v188_v15 }
   0x2   :  { %v28_v2 = vsel %vm27_vm0, %v25_v0, 0.0  ;;  %v31_v3 = vsel %vm27_vm0, %v26_v1, 0.0  ;;  %v182_v14 = vld [vmem:[%s254_s3] sm:$0xff]   ;;  %v183_v16 = vld [vmem:[%s254_s3 + $0x8] sm:$0xff]  }
   0x3   :  { %29 = vadd.xlane.f32.xlu0 %v28_v2  ;;  %173 = vmatpush3.bf16.msra.mxu0 %v182_v14  ;;  %v159_v25 = vld [vmem:[%s255_s1] ss:$0 sm:$0xff] }
   0x4   :  { %174 = vmatprep.subr.bf16.mxu0 %v188_v15  ;;  %v160_v29 = vld [vmem:[%s256_s2] ss:$0 sm:$0xff] }
   0x5   :  { %v161_v35 = vld [vmem:[%s257_s4] ss:$0 sm:$0xff] }
   0x7   :  { %32 = vadd.xlane.f32.xlu0 %v31_v3  ;;  %175 = vmatpush3.bf16.msra.mxu0 %v183_v16 }
  0x90   :  { %v30_v4 = vpop.xlane.xlu0 %29 }
  0x91   :  { %v35_v5 = vmul.f32 0.03125, %v30_v4 }
  0x93   :  { %v37_v6 = vsub.f32 %v25_v0, %v35_v5 }
  0x94   :  { %v33_v7 = vpop.xlane.xlu0 %32 }
  0x95   :  { %v36_v8 = vmul.f32 0.03125, %v33_v7  ;;  %v39_v9 = vmul.f32 %v37_v6, %v37_v6 }
  0x97   :  { %v38_v10 = vsub.f32 %v26_v1, %v36_v8  ;;  %v41_v11 = vsel %vm27_vm0, %v39_v9, 0.0 }
  0x98   :  { %42 = vadd.xlane.f32.xlu1 %v41_v11 }
  0x99   :  { %v40_v12 = vmul.f32 %v38_v10, %v38_v10 }
  0x9b   :  { %v44_v13 = vsel %vm27_vm0, %v40_v12, 0.0 }
  0x9c   :  { %45 = vadd.xlane.f32.xlu1 %v44_v13 }
 0x125   :  { %v43_v17 = vpop.xlane.xlu1 %42 }
 0x126   :  { %v47_v18 = vmul.f32 0.03125, %v43_v17 }
 0x128   :  { %v49_v19 = vadd.f32 1e-05, %v47_v18 }
 0x129   :  { %v46_v20 = vpop.xlane.xlu1 %45 }
 0x12a   :  { %184 = vrsqrt.f32 %v49_v19  ;;  %v48_v21 = vmul.f32 0.03125, %v46_v20 }
 0x12c   :  { %v50_v22 = vadd.f32 1e-05, %v48_v21 }
 0x12e   :  { %186 = vrsqrt.f32 %v50_v22 }
 0x134   :  { %v185_v23 = vpop.eup %184 }
 0x135   :  { %v53_v24 = vmul.f32 %v185_v23, %v37_v6 }
 0x137   :  { %v62_v27 = vmul.f32 %v159_v25, %v53_v24 }
 0x138   :  { %v187_v26 = vpop.eup %186 }
 0x139   :  { %v54_v28 = vmul.f32 %v187_v26, %v38_v10  ;;  %v71_v31 = vadd.f32 %v160_v29, %v62_v27 }
 0x13b   :  { %v63_v30 = vmul.f32 %v159_v25, %v54_v28 }
 0x13d   :  { %v72_v32 = vadd.f32 %v160_v29, %v63_v30 }
 0x13f   :  { %v73_v33 = vpack.c.bf16 %v72_v32, %v71_v31 }
 0x141   :  { %74 = vst.msk [vmem:[#allocation2] sm:$0xff] %vm27_vm0, %v73_v33 }
 0x148   :  { %v75_v34 = vld [vmem:[#allocation2] sm:$0xff] }
 0x149   :  { %177 = vmatmul.mubr.msk.bf16.vlgmr.msra.gmra.mrb[0].mxu0 %vm27_vm0, %v75_v34 }
 0x21c   :  { %v137_v36 = vpop.f32.mrb[0].mxu0 }
 0x21d   :  { %v138_v37 = vadd.f32 %v161_v35, %v137_v36  ;;  %v178_v38 = vpop.f32.mrb[1].mxu0 }
 0x21e   :  { %v140_v39 = vpop.f32.mrb[2].mxu0 }
 0x21f   :  { %v167_v40 = vpack.c.bf16 %v138_v37, %v138_v37  ;;  %v141_v41 = vadd.f32 %v161_v35, %v140_v39  ;;  %v179_v42 = vpop.f32.mrb[3].mxu0 }
 0x221   :  { %153 = vst.msk [vmem:[%s258_s5] sm:$0xf] %vm152_vm2, %v167_v40  ;;  %v168_v43 = vpack.c.bf16 %v141_v41, %v141_v41 }
 0x223   :  { %154 = vst.msk [vmem:[%s258_s5 + $0x4] sm:$0xf] %vm152_vm2, %v168_v43 }

// kernel: gpt_forward.9
= control target key start
LH: loop header
LB: loop body
LE: loop exit
PB: predicated region body
PF: predicated region fallthrough
CT: control target
= control target key end

     0   :  { %vm33_vm0 = vcmask 261120   ;;  %v381_v15 = vmov 0.0   ;;  %vm382_vm1 = vmmov 0   ;;  %s499_s0 = inlined_call_operand.vmem [shape: f32[16,32], index: 0, kind: input, shape index: {}]   ;;  %s500_s3 = inlined_call_operand.vmem [shape: bf16[32,128], index: 3, kind: input, shape index: {}]   ;;  %s501_s1 = inlined_call_operand.vmem [shape: f32[1,32], index: 1, kind: input, shape index: {}]   ;;  %s502_s2 = inlined_call_operand.vmem [shape: f32[1,32], index: 2, kind: input, shape index: {}]   ;;  %s503_s5 = inlined_call_operand.vmem [shape: bf16[128,32], index: 5, kind: input, shape index: {}]   ;;  %s504_s4 = inlined_call_operand.vmem [shape: f32[1,128], index: 4, kind: input, shape index: {}]   ;;  %s505_s6 = inlined_call_operand.vmem [shape: f32[1,32], index: 6, kind: input, shape index: {}]   ;;  %s506_s7 = inlined_call_operand.vmem [shape: f32[16,32], index: 7, kind: output, shape index: {}]  }
   0x1   :  { %v426_v0 = vld [vmem:[%s499_s0] sm:$0xff]  ;;  %v431_v1 = vld [vmem:[%s499_s0 + $0x8] sm:$0xff]  ;;  %333 = vmatprep.subr.bf16.mxu0 %v381_v15  ;;  %81 = vst.msk [vmem:[#allocation3] sm:$0xff] %vm33_vm0, %v381_v15  ;;  %82 = vst.msk [vmem:[#allocation3 + $0x8] sm:$0xff] %vm33_vm0, %v381_v15  ;;  %341 = vmatprep.subr.bf16.mxu1 %v381_v15 }
   0x2   :  { %v34_v2 = vsel %vm33_vm0, %v426_v0, 0.0  ;;  %v37_v3 = vsel %vm33_vm0, %v431_v1, 0.0  ;;  %v363_v14 = vld [vmem:[%s500_s3] sm:$0xff]   ;;  %v364_v16 = vld [vmem:[%s500_s3 + $0x8] sm:$0xff]   ;;  %337 = vmatprep.mubr.msk.bf16.mxu0 %vm382_vm1, %v381_v15  ;;  %357 = vmatprep.mubr.msk.bf16.mxu1 %vm382_vm1, %v381_v15  ;;  %v367_v37 = vld [vmem:[%s503_s5 + $0x10] sm:$0xff]  }
   0x3   :  { %35 = vadd.xlane.f32.xlu0 %v34_v2  ;;  %334 = vmatpush3.bf16.msra.mxu0 %v363_v14  ;;  %v306_v25 = vld [vmem:[%s501_s1] ss:$0 sm:$0xff]  ;;  %v366_v36 = vld [vmem:[%s503_s5 + $0x8] sm:$0xff]   ;;  %v368_v38 = vld [vmem:[%s503_s5 + $0x18] sm:$0xff]  }
   0x4   :  { %335 = vmatprep.subr.bf16.mxu0 %v381_v15  ;;  %v307_v29 = vld [vmem:[%s502_s2] ss:$0 sm:$0xff]  ;;  %v370_v40 = vld [vmem:[%s503_s5 + $0x28] sm:$0xff]   ;;  %v371_v41 = vld [vmem:[%s503_s5 + $0x30] sm:$0xff]  }
   0x5   :  { %v365_v35 = vld [vmem:[%s503_s5] sm:$0xff]   ;;  %v372_v42 = vld [vmem:[%s503_s5 + $0x38] sm:$0xff]  }
   0x6   :  { %342 = vmatpush3.bf16.msra.mxu1 %v365_v35  ;;  %v369_v39 = vld [vmem:[%s503_s5 + $0x20] sm:$0xff]  }
   0x7   :  { %38 = vadd.xlane.f32.xlu0 %v37_v3  ;;  %336 = vmatpush3.bf16.msra.mxu0 %v364_v16  ;;  %v308_v43 = vld [vmem:[%s504_s4] ss:$0 sm:$0xff] }
   0x8   :  { %343 = vmatprep.subr.bf16.mxu1 %v381_v15  ;;  %v320_v16 = vld [vmem:[%s505_s6] ss:$0 sm:$0xff] }
   0xa   :  { %344 = vmatpush3.bf16.msra.mxu1 %v366_v36 }
   0xb   :  { %345 = vmatprep.subr.bf16.mxu1 %v381_v15 }
   0xe   :  { %346 = vmatpush3.bf16.msra.mxu1 %v367_v37 }
   0xf   :  { %347 = vmatprep.subr.bf16.mxu1 %v381_v15 }
  0x12   :  { %348 = vmatpush3.bf16.msra.mxu1 %v368_v38 }
  0x13   :  { %349 = vmatprep.subr.bf16.mxu1 %v381_v15 }
  0x16   :  { %350 = vmatpush3.bf16.msra.mxu1 %v369_v39 }
  0x17   :  { %351 = vmatprep.subr.bf16.mxu1 %v381_v15 }
  0x1a   :  { %352 = vmatpush3.bf16.msra.mxu1 %v370_v40 }
  0x1b   :  { %353 = vmatprep.subr.bf16.mxu1 %v381_v15 }
  0x1e   :  { %354 = vmatpush3.bf16.msra.mxu1 %v371_v41 }
  0x1f   :  { %355 = vmatprep.subr.bf16.mxu1 %v381_v15 }
  0x22   :  { %356 = vmatpush3.bf16.msra.mxu1 %v372_v42 }
  0x90   :  { %v36_v4 = vpop.xlane.xlu0 %35 }
  0x91   :  { %v41_v5 = vmul.f32 0.03125, %v36_v4 }
  0x93   :  { %v43_v6 = vsub.f32 %v426_v0, %v41_v5 }
  0x94   :  { %v39_v7 = vpop.xlane.xlu0 %38 }
  0x95   :  { %v42_v8 = vmul.f32 0.03125, %v39_v7  ;;  %v45_v9 = vmul.f32 %v43_v6, %v43_v6  ;;  %v170_v7 = vld [vmem:[#allocation3] sm:$0xff] }
  0x97   :  { %v44_v10 = vsub.f32 %v431_v1, %v42_v8  ;;  %v47_v11 = vsel %vm33_vm0, %v45_v9, 0.0  ;;  %v171_v9 = vld [vmem:[#allocation3 + $0x8] sm:$0xff] }
  0x98   :  { %48 = vadd.xlane.f32.xlu1 %v47_v11 }
  0x99   :  { %v46_v12 = vmul.f32 %v44_v10, %v44_v10 }
  0x9b   :  { %v50_v13 = vsel %vm33_vm0, %v46_v12, 0.0 }
  0x9c   :  { %51 = vadd.xlane.f32.xlu1 %v50_v13 }
 0x125   :  { %v49_v17 = vpop.xlane.xlu1 %48 }
 0x126   :  { %v53_v18 = vmul.f32 0.03125, %v49_v17 }
 0x128   :  { %v55_v19 = vadd.f32 1e-05, %v53_v18 }
 0x129   :  { %v52_v20 = vpop.xlane.xlu1 %51 }
 0x12a   :  { %373 = vrsqrt.f32 %v55_v19  ;;  %v54_v21 = vmul.f32 0.03125, %v52_v20 }
 0x12c   :  { %v56_v22 = vadd.f32 1e-05, %v54_v21 }
 0x12e   :  { %375 = vrsqrt.f32 %v56_v22 }
 0x134   :  { %v374_v23 = vpop.eup %373 }
 0x135   :  { %v59_v24 = vmul.f32 %v374_v23, %v43_v6 }
 0x137   :  { %v68_v27 = vmul.f32 %v306_v25, %v59_v24 }
 0x138   :  { %v376_v26 = vpop.eup %375 }
 0x139   :  { %v60_v28 = vmul.f32 %v376_v26, %v44_v10  ;;  %v77_v31 = vadd.f32 %v307_v29, %v68_v27 }
 0x13b   :  { %v69_v30 = vmul.f32 %v306_v25, %v60_v28 }
 0x13d   :  { %v78_v32 = vadd.f32 %v307_v29, %v69_v30 }
 0x13f   :  { %v79_v33 = vpack.c.bf16 %v78_v32, %v77_v31 }
 0x141   :  { %80 = vst.msk [vmem:[#allocation2] sm:$0xff] %vm33_vm0, %v79_v33 }
 0x148   :  { %v83_v34 = vld [vmem:[#allocation2] sm:$0xff] }
 0x149   :  { %338 = vmatmul.mubr.msk.bf16.vlgmr.msra.gmra.mrb[0].mxu0 %vm33_vm0, %v83_v34 }
 0x21c   :  { %v145_v44 = vpop.f32.mrb[0].mxu0 }
 0x21d   :  { %v146_v45 = vadd.f32 %v308_v43, %v145_v44  ;;  %v339_v46 = vpop.f32.mrb[1].mxu0 }
 0x21e   :  { %v148_v47 = vpop.f32.mrb[2].mxu0 }
 0x21f   :  { %v154_v48 = vmul.f32 0.044715, %v146_v45  ;;  %v149_v49 = vadd.f32 %v308_v43, %v148_v47  ;;  %v340_v50 = vpop.f32.mrb[3].mxu0  ;;  %v152_v63 = vmul.f32 0.5, %v146_v45 }
 0x221   :  { %v156_v51 = vmul.f32 %v154_v48, %v146_v45  ;;  %v155_v52 = vmul.f32 0.044715, %v149_v49  ;;  %v153_v2 = vmul.f32 0.5, %v149_v49 }
 0x223   :  { %v158_v53 = vmul.f32 %v156_v51, %v146_v45  ;;  %v157_v54 = vmul.f32 %v155_v52, %v149_v49 }
 0x225   :  { %v159_v55 = vmul.f32 %v157_v54, %v149_v49  ;;  %v160_v56 = vadd.f32 %v158_v53, %v146_v45 }
 0x227   :  { %v161_v57 = vadd.f32 %v159_v55, %v149_v49  ;;  %v162_v58 = vmul.f32 0.7978846, %v160_v56 }
 0x229   :  { %v163_v59 = vmul.f32 0.7978846, %v161_v57  ;;  %377 = vtanh.f32 %v162_v58 }
 0x22b   :  { %379 = vtanh.f32 %v163_v59 }
 0x233   :  { %v378_v60 = vpop.eup %377 }
 0x234   :  { %v166_v61 = vadd.f32 1.0, %v378_v60 }
 0x235   :  { %v380_v62 = vpop.eup %379 }
 0x236   :  { %v167_v3 = vadd.f32 1.0, %v380_v62  ;;  %v168_v4 = vmul.f32 %v166_v61, %v152_v63 }
 0x238   :  { %v169_v5 = vmul.f32 %v167_v3, %v153_v2 }
 0x23a   :  { %v172_v6 = vpack.c.bf16 %v169_v5, %v168_v4 }
 0x23c   :  { %358 = vmatmul.mubr.bf16.vlgmr.msra.gmra.mrb[0].mxu1 %v172_v6 }
 0x30f   :  { %v271_v8 = vpop.f32.mrb[0].mxu1 }
 0x310   :  { %v278_v10 = vadd.f32 %v271_v8, %v170_v7  ;;  %v359_v11 = vpop.f32.mrb[1].mxu1 }
 0x311   :  { %v274_v12 = vpop.f32.mrb[2].mxu1 }
 0x312   :  { %280 = vst.msk [vmem:[#allocation3] sm:$0xff] %vm33_vm0, %v278_v10  ;;  %v279_v13 = vadd.f32 %v274_v12, %v171_v9  ;;  %v360_v14 = vpop.f32.mrb[3].mxu1 }
 0x314   :  { %281 = vst.msk [vmem:[#allocation3 + $0x8] sm:$0xff] %vm33_vm0, %v279_v13 }
 0x319   :  { %v287_v15 = vld [vmem:[#allocation3] sm:$0xff] }
 0x31a   :  { %v289_v17 = vadd.f32 %v287_v15, %v426_v0 }
 0x31b   :  { %v288_v18 = vld [vmem:[#allocation3 + $0x8] sm:$0xff] }
 0x31c   :  { %v298_v19 = vadd.f32 %v320_v16, %v289_v17  ;;  %v290_v20 = vadd.f32 %v288_v18, %v431_v1 }
 0x31e   :  { %300 = vst.msk [vmem:[%s506_s7] sm:$0xff] %vm33_vm0, %v298_v19  ;;  %v299_v21 = vadd.f32 %v320_v16, %v290_v20 }
 0x320   :  { %301 = vst.msk [vmem:[%s506_s7 + $0x8] sm:$0xff] %vm33_vm0, %v299_v21 }

// kernel: gpt_forward.8
= control target key start
LH: loop header
LB: loop body
LE: loop exit
PB: predicated region body
PF: predicated region fallthrough
CT: control target
= control target key end

     0   :  { %s1125_s15 = smov 0   ;;  %s1127_s16 = smov 0   ;;  %s1267_s0 = inlined_call_operand.vmem [shape: bf16[16,96], index: 0, kind: input, shape index: {}]   ;;  %s1268_s1 = inlined_call_operand.vmem [shape: f32[16,32], index: 1, kind: input, shape index: {}]   ;;  %s1269_s2 = inlined_call_operand.vmem [shape: bf16[32,32], index: 2, kind: input, shape index: {}]   ;;  %s1270_s3 = inlined_call_operand.vmem [shape: f32[1,32], index: 3, kind: input, shape index: {}]   ;;  %s1271_s4 = inlined_call_operand.vmem [shape: f32[16,32], index: 4, kind: output, shape index: {}]  }
   0x1   :  { %s1129_s17 = smov 0  }
   0x2 LB: > { %s26_s18 = sadd.s32 1, %s1078_s16  ;;  %p901_p0 = scmp.ge.s32.totalorder %s1082_s17, 1  ;;  %s1082_s17 = sphi %s1129_s17, %s14_s17   ;;  %s1078_s16 = sphi %s1127_s16, %s1273_s16   ;;  %s1074_s15 = sphi %s1125_s15, %s1272_s15  }
   0x3   : > { %p28_p1 = scmp.ge.s32.totalorder %s26_s18, 2  ;;  %p188_p2 = scmp.lt.s32.totalorder %s1082_s17, 3 }
   0x5   : > { %s1275_s18 = smov (%p28_p1, %s26_s18), 0  ;;  %p189_p3 = pnand %p901_p0, %p188_p2 }
   0x6   : > { %p218_p4 = scmp.lt.s32.totalorder (!%p189_p3), %s1074_s15, 1  ;;  %v1084_v0 = vmov (!%p189_p3), 0.0   ;;  %vm1085_vm0 = vmmov (!%p189_p3), 0   ;;  %s1086_s23 = smov (!%p189_p3), 96   ;;  %vm257_vm1 = vcmask (!%p189_p3), 64512   ;;  %v236_v9 = vlaneseq (!%p189_p3) }
   0x7   : > { %192 = sbr.rel (%p189_p3) target bundleno = 1822 (0x71e), region = 36  ;;  %942 = vmatprep.subr.bf16.mxu0 (!%p189_p3), %v1084_v0  ;;  %944 = vmatprep.mubr.msk.bf16.mxu0 (!%p189_p3), %vm1085_vm0, %v1084_v0  ;;  %s1087_s24 = smov (!%p189_p3), 64   ;;  %vm322_vm3 = vcmask (!%p189_p3), 1043456   ;;  %vm491_vm4 = vcmask (!%p189_p3), 130112   ;;  %vm617_vm5 = vcmask (!%p189_p3), 195712   ;;  %vm743_vm6 = vcmask (!%p189_p3), 261312  }
   0x8   : > { %948 = vmatprep.subr.bf16.mxu1 (!%p189_p3), %v1084_v0  ;;  %950 = vmatprep.mubr.msk.bf16.mxu1 (!%p189_p3), %vm1085_vm0, %v1084_v0  ;;  %s1088_s25 = smov (!%p189_p3), 88   ;;  %v1168_v10 = vshrl.u32 (!%p189_p3), %v236_v9, 7  ;;  %v1170_v11 = vand.u32 (!%p189_p3), 127, %v236_v9  ;;  %s1089_s26 = smov (!%p189_p3), 72   ;;  %vm763_vm7 = vcmask (!%p189_p3), 261120  }
   0x9   : > { %s1090_s27 = smov (!%p189_p3), 120   ;;  %s1091_s28 = smov (!%p189_p3), 80  }
   0xa   : > { %vm242_vm2 = vcmp.le.s32.totalorder (!%p189_p3), %v1170_v11, %v1168_v10  ;;  %s1092_s29 = smov (!%p189_p3), 112   ;;  %s1093_s30 = smov (!%p189_p3), 104  }
   0xb   : > { %s1094_s5 = smov (!%p189_p3), 56   ;;  %s1095_s6 = smov (!%p189_p3), 48  }
   0xc   : > { %s1096_s7 = smov (!%p189_p3), 40   ;;  %s1097_s8 = smov (!%p189_p3), 8  }
   0xd   : > { %s1098_s13 = smov (!%p189_p3), 16   ;;  %s1099_s14 = smov (!%p189_p3), 24  }
   0xe   : > { %s1277_s15 = smov (!%p218_p4, %s1074_s15), 1 }
   0xf   : > { %s902_s19 = sshll.u32 %s1277_s15, 2 }
  0x10   : > { %s1155_s22 = scalar_lea.vmem %s1267_s0, %s902_s19  ;;  %s903_s19 = sshll.u32 %s1277_s15, 3 }
  0x11   : > { %v1038_v1 = vld [vmem:[%s1155_s22] ss:$0 sps:$4 sm:$0xff]  }
  0x12   : > { %255 = vrot.lane.b32.xlu0 %v1038_v1, %s1086_s23  ;;  %v247_v2 = vld [vmem:[%s1155_s22] sm:$0xf]  ;;  %317 = vrot.lane.b32.xlu1 %v1038_v1, %s1087_s24 }
  0x13   : > { %v248_v3 = vunpack.c.l.bf16 %v247_v2  ;;  %v1165_v8 = vld [vmem:[%s1155_s22] ss:$0 sps:$4 sm:$0xff]  }
  0x14   : > { %v1179_v18 = vld [vmem:[%s1155_s22] ss:$0 sps:$4 sm:$0xff]  }
  0x15   : > { %v249_v6 = vmul.f32 0.35355338, %v248_v3  ;;  %v367_v26 = vld [vmem:[%s1155_s22] sm:$0xf] }
  0x16   : > { %378 = vrot.lane.b32.xlu1 %v1165_v8, %s1088_s25  ;;  %v368_v27 = vunpack.c.l.bf16 %v367_v26  ;;  %v493_v29 = vld [vmem:[%s1155_s22] sm:$0xf] }
  0x17   : > { %v250_v7 = vpack.c.bf16 %v249_v6, %v249_v6  ;;  %v494_v31 = vunpack.c.l.bf16 %v493_v29  ;;  %v619_v32 = vld [vmem:[%s1155_s22] sm:$0xf] }
  0x18   : > { %v369_v28 = vmul.f32 0.35355338, %v368_v27  ;;  %v1189_v33 = vld [vmem:[%s1155_s22] ss:$0 sps:$4 sm:$0xff]   ;;  %v620_v35 = vunpack.c.l.bf16 %v619_v32  ;;  %s226_s22 = scalar_lea.vmem %s1268_s1, %s903_s19 }
  0x19   : > { %v495_v34 = vmul.f32 0.35355338, %v494_v31 }
  0x1a   : > { %v370_v30 = vpack.c.bf16 %v369_v28, %v369_v28  ;;  %v621_v37 = vmul.f32 0.35355338, %v620_v35 }
  0x1b   : > { %v496_v36 = vpack.c.bf16 %v495_v34, %v495_v34 }
  0x1c   : > { %v622_v38 = vpack.c.bf16 %v621_v37, %v621_v37 }
  0x84   : > { %v256_v4 = vpop.permute.xlu0 %255  ;;  %v318_v19 = vpop.permute.xlu1 %317 }
  0x85   : > { %v262_v5 = vsel %vm257_vm1, %v256_v4, 0  ;;  %v324_v20 = vsel %vm322_vm3, %v318_v19, 0 }
  0x86   : > { %943 = vmatpush3.bf16.xpose.msra.mxu0 %v262_v5  ;;  %949 = vmatpush3.bf16.msra.mxu1 %v324_v20 }
  0x87   : > { %960 = vmatprep.subr.bf16.mxu0 %v1084_v0  ;;  %954 = vmatprep.subr.bf16.mxu1 %v1084_v0 }
  0x88   : > { %v379_v39 = vpop.permute.xlu1 %378 }
  0x89   : > { %v384_v45 = vsel %vm257_vm1, %v379_v39, 0 }
  0x8d   : > { %945 = vmatmul.mubr.msk.bf16.vlgmr.msra.gmra.mrb[0].mxu0 %vm257_vm1, %v250_v7 }
  0x8e   : > { %962 = vmatprep.mubr.msk.bf16.mxu0 %vm1085_vm0, %v1084_v0 }
 0x160   : > { %v298_v12 = vpop.f32.mrb[0].mxu0 }
 0x161   : > { %v304_v13 = vsel %vm242_vm2, %v298_v12, -1e+30  ;;  %v946_v14 = vpop.f32.mrb[1].mxu0 }
 0x162   : > { %v301_v15 = vpop.f32.mrb[2].mxu0  ;;  %v305_v16 = vsel %vm257_vm1, %v304_v13, -inf }
 0x163   : > { %306 = vmax.xlane.f32.xlu0 %v305_v16  ;;  %v947_v17 = vpop.f32.mrb[3].mxu0 }
 0x179   : > { %630 = vrot.lane.b32.xlu0 %v1179_v18, %s1089_s26 }
 0x1f0   : > { %v307_v21 = vpop.xlane.xlu0 %306 }
 0x1f1   : > { %v308_v22 = vsub.f32 %v304_v13, %v307_v21 }
 0x1f3   : > { %v309_v23 = vmul.f32 1.442695, %v308_v22 }
 0x1f4   : > { %v631_v48 = vpop.permute.xlu0 %630 }
 0x1f5   : > { %1044 = vpow2.f32 %v309_v23  ;;  %v636_v50 = vsel %vm257_vm1, %v631_v48, 0  ;;  %v1042_v48 = vld [vmem:[%s1269_s2] sm:$0xff]  }
 0x1ff   : > { %v1045_v24 = vpop.eup %1044 }
 0x200   : > { %v311_v25 = vsel %vm257_vm1, %v1045_v24, 0.0 }
 0x201   : > { %312 = vadd.xlane.f32.xlu1 %v311_v25 }
 0x212   : > { %373 = vrot.lane.b32.xlu1 %v370_v30, %s1090_s27  ;;  %s232_s27 = scalar_lea.vmem %s1271_s4, %s903_s19 }
 0x216   : > { %504 = vrot.lane.b32.xlu1 %v1189_v33, %s1091_s28 }
 0x21a   : > { %499 = vrot.lane.b32.xlu1 %v496_v36, %s1092_s29 }
 0x21e   : > { %625 = vrot.lane.b32.xlu1 %v622_v38, %s1093_s30 }
 0x28e   : > { %v313_v40 = vpop.xlane.xlu1 %312 }
 0x28f   : > { %1046 = vrcp.f32 %v313_v40 }
 0x292   : > { %v374_v43 = vpop.permute.xlu1 %373 }
 0x296   : > { %v505_v46 = vpop.permute.xlu1 %504 }
 0x297   : > { %v510_v47 = vsel %vm257_vm1, %v505_v46, 0 }
 0x299   : > { %v1047_v41 = vpop.eup %1046 }
 0x29a   : > { %v315_v42 = vmul.f32 %v1047_v41, %v1045_v24  ;;  %v500_v49 = vpop.permute.xlu1 %499 }
 0x29c   : > { %v316_v44 = vpack.c.bf16 %v315_v42, %v315_v42 }
 0x29e   : > { %951 = vmatmul.mubr.msk.bf16.vlgmr.msra.gmra.mrb[0].mxu1 %vm257_vm1, %v316_v44  ;;  %v626_v51 = vpop.permute.xlu1 %625 }
 0x29f   : > { %955 = vmatpush3.bf16.xpose.msra.mxu1 %v384_v45  ;;  %956 = vmatprep.mubr.msk.bf16.mxu1 %vm1085_vm0, %v1084_v0 }
 0x2a0   : > { %966 = vmatprep.subr.bf16.mxu1 %v1084_v0 }
 0x2a6   : > { %957 = vmatmul.mubr.msk.bf16.vlgmr.msra.gmra.mrb[4].mxu1 %vm257_vm1, %v374_v43 }
 0x2a7   : > { %967 = vmatpush3.bf16.xpose.msra.mxu1 %v510_v47  ;;  %968 = vmatprep.mubr.msk.bf16.mxu1 %vm1085_vm0, %v1084_v0 }
 0x2a8   : > { %978 = vmatprep.subr.bf16.mxu1 %v1084_v0 }
 0x2ae   : > { %969 = vmatmul.mubr.msk.bf16.vlgmr.msra.gmra.mrb[8].mxu1 %vm257_vm1, %v500_v49  ;;  %v1043_v49 = vld [vmem:[%s1269_s2 + $0x8] sm:$0xff]  }
 0x2af   : > { %979 = vmatpush3.bf16.xpose.msra.mxu1 %v636_v50  ;;  %980 = vmatprep.mubr.msk.bf16.mxu1 %vm1085_vm0, %v1084_v0 }
 0x2b0   : > { %990 = vmatprep.subr.bf16.mxu1 %v1084_v0 }
 0x2b6   : > { %981 = vmatmul.mubr.msk.bf16.vlgmr.msra.gmra.mrb[12].mxu1 %vm257_vm1, %v626_v51 }
 0x2b7   : > { %994 = vmatprep.mubr.msk.bf16.mxu1 %vm1085_vm0, %v1084_v0  ;;  %991 = vmatpush3.bf16.msra.mxu1 %v1042_v48 }
 0x2b8   : > { %992 = vmatprep.subr.bf16.mxu1 %v1084_v0 }
 0x2bb   : > { %993 = vmatpush3.bf16.msra.mxu1 %v1043_v49 }
 0x371   : > { %v360_v52 = vpop.f32.mrb[0].mxu1 }
 0x372   : > { %366 = vst.msk [vmem:[#allocation2] sm:$0xff] %vm257_vm1, %v360_v52  ;;  %v952_v53 = vpop.f32.mrb[1].mxu1 }
 0x373   : > { %v363_v54 = vpop.f32.mrb[2].mxu1 }
 0x374   : > { %v953_v55 = vpop.f32.mrb[3].mxu1 }
 0x379   : > { %v420_v56 = vpop.f32.mrb[4].mxu1 }
 0x37a   : > { %v426_v57 = vsel %vm242_vm2, %v420_v56, -1e+30  ;;  %v958_v58 = vpop.f32.mrb[5].mxu1 }
 0x37b   : > { %v423_v59 = vpop.f32.mrb[6].mxu1  ;;  %v427_v60 = vsel %vm257_vm1, %v426_v57, -inf }
 0x37c   : > { %428 = vmax.xlane.f32.xlu1 %v427_v60  ;;  %v959_v61 = vpop.f32.mrb[7].mxu1 }
 0x381   : > { %v546_v62 = vpop.f32.mrb[8].mxu1 }
 0x382   : > { %v552_v63 = vsel %vm242_vm2, %v546_v62, -1e+30  ;;  %v970_v1 = vpop.f32.mrb[9].mxu1  ;;  %v807_v62 = vld [vmem:[%s226_s22] sm:$0xff] }
 0x383   : > { %v553_v2 = vsel %vm257_vm1, %v552_v63, -inf  ;;  %v549_v3 = vpop.f32.mrb[10].mxu1  ;;  %v920_v1 = vld [vmem:[%s1270_s3] ss:$0 sm:$0xff] }
 0x384   : > { %554 = vmax.xlane.f32.xlu0 %v553_v2  ;;  %v971_v4 = vpop.f32.mrb[11].mxu1 }
 0x389   : > { %v672_v5 = vpop.f32.mrb[12].mxu1 }
 0x38a   : > { %v678_v6 = vsel %vm242_vm2, %v672_v5, -1e+30  ;;  %v982_v7 = vpop.f32.mrb[13].mxu1 }
 0x38b   : > { %v679_v9 = vsel %vm257_vm1, %v678_v6, -inf  ;;  %v675_v12 = vpop.f32.mrb[14].mxu1 }
 0x38c   : > { %680 = vmax.xlane.f32.xlu1 %v679_v9  ;;  %v983_v13 = vpop.f32.mrb[15].mxu1 }
 0x409   : > { %v429_v14 = vpop.xlane.xlu1 %428 }
 0x40a   : > { %v430_v15 = vsub.f32 %v426_v57, %v429_v14 }
 0x40c   : > { %v431_v16 = vmul.f32 1.442695, %v430_v15 }
 0x40e   : > { %1048 = vpow2.f32 %v431_v16 }
 0x411   : > { %v555_v23 = vpop.xlane.xlu0 %554 }
 0x412   : > { %v556_v24 = vsub.f32 %v552_v63, %v555_v23 }
 0x414   : > { %v557_v25 = vmul.f32 1.442695, %v556_v24 }
 0x418   : > { %v1049_v17 = vpop.eup %1048 }
 0x419   : > { %v681_v19 = vpop.xlane.xlu1 %680  ;;  %v433_v20 = vsel %vm257_vm1, %v1049_v17, 0.0 }
 0x41a   : > { %v682_v21 = vsub.f32 %v678_v6, %v681_v19  ;;  %434 = vadd.xlane.f32.xlu1 %v433_v20 }
 0x41c   : > { %v683_v22 = vmul.f32 1.442695, %v682_v21 }
 0x41e   : > { %1050 = vpow2.f32 %v683_v22 }
 0x41f   : > { %1052 = vpow2.f32 %v557_v25 }
 0x428   : > { %v1051_v10 = vpop.eup %1050 }
 0x429   : > { %v685_v11 = vsel %vm257_vm1, %v1051_v10, 0.0  ;;  %v1053_v26 = vpop.eup %1052 }
 0x42a   : > { %686 = vadd.xlane.f32.xlu0 %v685_v11  ;;  %v559_v27 = vsel %vm257_vm1, %v1053_v26, 0.0 }
 0x42b   : > { %439 = vrot.lane.b32.xlu1 %v1165_v8, %s1094_s5 }
 0x440   : > { %565 = vrot.lane.b32.xlu0 %v1189_v33, %s1095_s6 }
 0x44f   : > { %560 = vadd.xlane.f32.xlu1 %v559_v27 }
 0x460   : > { %691 = vrot.lane.b32.xlu1 %v1179_v18, %s1096_s7 }
 0x4a7   : > { %v435_v28 = vpop.xlane.xlu1 %434 }
 0x4a8   : > { %1054 = vrcp.f32 %v435_v28 }
 0x4ab   : > { %v440_v29 = vpop.permute.xlu1 %439 }
 0x4ac   : > { %v445_v30 = vsel %vm322_vm3, %v440_v29, 0 }
 0x4ad   : > { %961 = vmatpush3.bf16.msra.mxu0 %v445_v30 }
 0x4ae   : > { %972 = vmatprep.subr.bf16.mxu0 %v1084_v0 }
 0x4b2   : > { %v1055_v8 = vpop.eup %1054 }
 0x4b3   : > { %v437_v31 = vmul.f32 %v1055_v8, %v1049_v17 }
 0x4b5   : > { %v438_v32 = vpack.c.bf16 %v437_v31, %v437_v31 }
 0x4b7   : > { %963 = vmatmul.mubr.msk.bf16.vlgmr.msra.gmra.mrb[4].mxu0 %vm257_vm1, %v438_v32  ;;  %v687_v33 = vpop.xlane.xlu0 %686 }
 0x4b8   : > { %974 = vmatprep.mubr.msk.bf16.mxu0 %vm1085_vm0, %v1084_v0 }
 0x4bb   : > { %v566_v34 = vpop.permute.xlu0 %565 }
 0x4bc   : > { %v571_v18 = vsel %vm322_vm3, %v566_v34, 0 }
 0x4bd   : > { %973 = vmatpush3.bf16.msra.mxu0 %v571_v18 }
 0x4be   : > { %984 = vmatprep.subr.bf16.mxu0 %v1084_v0 }
 0x4dc   : > { %v561_v35 = vpop.xlane.xlu1 %560 }
 0x4dd   : > { %1056 = vrcp.f32 %v561_v35 }
 0x4de   : > { %1058 = vrcp.f32 %v687_v33 }
 0x4e0   : > { %v692_v37 = vpop.permute.xlu1 %691 }
 0x4e1   : > { %v697_v39 = vsel %vm322_vm3, %v692_v37, 0 }
 0x4e7   : > { %v1057_v36 = vpop.eup %1056 }
 0x4e8   : > { %v563_v38 = vmul.f32 %v1057_v36, %v1053_v26  ;;  %v1059_v41 = vpop.eup %1058 }
 0x4e9   : > { %v689_v42 = vmul.f32 %v1059_v41, %v1051_v10 }
 0x4ea   : > { %v564_v40 = vpack.c.bf16 %v563_v38, %v563_v38 }
 0x4eb   : > { %v690_v43 = vpack.c.bf16 %v689_v42, %v689_v42 }
 0x4ec   : > { %975 = vmatmul.mubr.msk.bf16.vlgmr.msra.gmra.mrb[8].mxu0 %vm257_vm1, %v564_v40 }
 0x4ed   : > { %985 = vmatpush3.bf16.msra.mxu0 %v697_v39  ;;  %986 = vmatprep.mubr.msk.bf16.mxu0 %vm1085_vm0, %v1084_v0 }
 0x4f4   : > { %987 = vmatmul.mubr.msk.bf16.vlgmr.msra.gmra.mrb[12].mxu0 %vm257_vm1, %v690_v43 }
 0x58a   : > { %v481_v44 = vpop.f32.mrb[4].mxu0 }
 0x58b   : > { %488 = vrot.lane.b32.xlu1 %v481_v44, %s1097_s8  ;;  %v964_v45 = vpop.f32.mrb[5].mxu0 }
 0x58c   : > { %v484_v46 = vpop.f32.mrb[6].mxu0 }
 0x58d   : > { %v965_v47 = vpop.f32.mrb[7].mxu0 }
 0x5bf   : > { %v607_v50 = vpop.f32.mrb[8].mxu0 }
 0x5c0   : > { %614 = vrot.lane.b32.xlu0 %v607_v50, %s1098_s13  ;;  %v976_v51 = vpop.f32.mrb[9].mxu0 }
 0x5c1   : > { %v610_v52 = vpop.f32.mrb[10].mxu0 }
 0x5c2   : > { %v977_v53 = vpop.f32.mrb[11].mxu0 }
 0x5c7   : > { %v733_v54 = vpop.f32.mrb[12].mxu0 }
 0x5c8   : > { %740 = vrot.lane.b32.xlu1 %v733_v54, %s1099_s14  ;;  %v988_v55 = vpop.f32.mrb[13].mxu0 }
 0x5c9   : > { %v736_v56 = vpop.f32.mrb[14].mxu0 }
 0x5ca   : > { %v989_v57 = vpop.f32.mrb[15].mxu0 }
 0x5fd   : > { %v489_v58 = vpop.permute.xlu1 %488 }
 0x5fe   : > { %492 = vst.msk [vmem:[#allocation2] sm:$0xff] %vm491_vm4, %v489_v58 }
 0x632   : > { %v615_v59 = vpop.permute.xlu0 %614 }
 0x633   : > { %618 = vst.msk [vmem:[#allocation2] sm:$0xff] %vm617_vm5, %v615_v59 }
 0x63a   : > { %v741_v0 = vpop.permute.xlu1 %740 }
 0x63b   : > { %744 = vst.msk [vmem:[#allocation2] sm:$0xff] %vm743_vm6, %v741_v0 }
 0x642   : > { %v745_v60 = vld [vmem:[#allocation2] sm:$0xff] }
 0x643   : > { %v746_v61 = vpack.c.bf16 %v745_v60, %v745_v60 }
 0x645   : > { %995 = vmatmul.mubr.msk.bf16.vlgmr.msra.gmra.mrb[16].mxu1 %vm763_vm7, %v746_v61 }
 0x718   : > { %v801_v63 = vpop.f32.mrb[16].mxu1 }
 0x719   : > { %v808_v2 = vadd.f32 %v807_v62, %v801_v63  ;;  %v996_v3 = vpop.f32.mrb[17].mxu1 }
 0x71a   : > { %v804_v4 = vpop.f32.mrb[18].mxu1 }
 0x71b   : > { %v816_v5 = vadd.f32 %v920_v1, %v808_v2  ;;  %v997_v6 = vpop.f32.mrb[19].mxu1 }
 0x71d   : > { %817 = vst.msk [vmem:[%s232_s27] sm:$0xff] %vm763_vm7, %v816_v5 }
 0x71e PF: > { %s14_s17 = sadd.s32 1, %s1082_s17   ;;  %s1272_s15 = smov %s1078_s16 }
 0x71f   : > { %p11_p5 = scmp.ge.s32.totalorder %s14_s17, 4   ;;  %s1273_s16 = smov %s1275_s18 }
 0x721   :  { %13 = sbr.rel (!%p11_p5) target bundleno = 2 (0x2), region = 70 }

</bundles_post_ra>
